<compile_context>
chip_gen: v6e
topology: v6e:2x2x1
jax: 0.10.0
libtpu: 0.0.40
codegen_flags: <defaults>
</compile_context>

<pallas_src>
import functools
import math

import jax
import jax.numpy as jnp
from jax.experimental import pallas as pl
from jax.experimental.pallas import tpu as pltpu


# ----------------------------------------------------------------------------
# Pallas kernel: (Cout, Kd) @ (Kd, tm) GEMM with fused bias/BN/LeakyReLU.
# ----------------------------------------------------------------------------
def _conv_gemm_kernel(w_ref, a_ref, scale_ref, shift_ref, o_ref, *, negative_slope):
    # bf16 operands, f32 accumulation on the MXU (single K step -> no scratch).
    acc = jnp.dot(w_ref[...], a_ref[...], preferred_element_type=jnp.float32)
    # Folded conv-bias + eval-mode BatchNorm:  y = conv * scale[c] + shift[c]
    y = acc * scale_ref[...] + shift_ref[...]
    if negative_slope is not None:  # fused LeakyReLU (static branch)
        y = jnp.where(y > 0, y, negative_slope * y)
    o_ref[...] = y.astype(o_ref.dtype)


def _pick_m_tile(m):
    """Largest convenient lane tile; avoid padding whenever a tile divides M."""
    for t in (512, 256, 128):
        if m % t == 0:
            return t, m
    if m <= 128:
        return m, m  # single full-extent block (legal even if not 128-aligned)
    t = 128
    return t, ((m + t - 1) // t) * t


def _fused_conv_gemm(wmat, a, scale, shift, negative_slope):
    """wmat: (Cout, Kd); a: (Kd, M) bf16; scale/shift: (Cout,) f32 -> (Cout, M) f32."""
    cout, kd = wmat.shape
    m = a.shape[1]
    tm, mp = _pick_m_tile(m)
    if mp != m:  # only pad M when a 128-tile does not divide it (never in demo)
        a = jnp.pad(a, ((0, 0), (0, mp - m)))

    w_b = wmat.astype(jnp.bfloat16)
    a_b = a.astype(jnp.bfloat16)
    scale2 = scale.reshape(cout, 1).astype(jnp.float32)
    shift2 = shift.reshape(cout, 1).astype(jnp.float32)

    kernel = functools.partial(_conv_gemm_kernel, negative_slope=negative_slope)
    out = pl.pallas_call(
        kernel,
        out_shape=jax.ShapeDtypeStruct((cout, mp), jnp.float32),
        grid_spec=pltpu.PrefetchScalarGridSpec(
            num_scalar_prefetch=0,
            grid=(mp // tm,),
            in_specs=[
                pl.BlockSpec((cout, kd), lambda i: (0, 0)),  # full weight, VMEM-resident
                pl.BlockSpec((kd, tm), lambda i: (0, i)),    # im2col tile, M on lanes
                pl.BlockSpec((cout, 1), lambda i: (0, 0)),   # folded BN scale
                pl.BlockSpec((cout, 1), lambda i: (0, 0)),   # folded BN shift (+bias)
            ],
            out_specs=pl.BlockSpec((cout, tm), lambda i: (0, i)),
        ),
        compiler_params=pltpu.CompilerParams(
            dimension_semantics=("parallel",),
            vmem_limit_bytes=48 * 1024 * 1024,  # safe on v7x (64 MiB physical)
        ),
    )(w_b, a_b, scale2, shift2)

    if mp != m:
        out = out[:, :m]
    return out


# ----------------------------------------------------------------------------
# Plain-JAX glue: channel-major im2col + per-layer wrapper.
# ----------------------------------------------------------------------------
def _im2col_cnhw(x_cnhw, kh, kw, stride, padding):
    """x: (C, N, H, W) -> A: (kh*kw*C, N*Ho*Wo); rows ordered tap-major, c-minor."""
    c, n, h, w = x_cnhw.shape
    xp = jnp.pad(x_cnhw, ((0, 0), (0, 0), (padding, padding), (padding, padding)))
    ho = (h + 2 * padding - kh) // stride + 1
    wo = (w + 2 * padding - kw) // stride + 1
    taps = []
    for i in range(kh):
        for j in range(kw):
            taps.append(
                xp[:, :, i:i + (ho - 1) * stride + 1:stride,
                         j:j + (wo - 1) * stride + 1:stride])
    a = jnp.stack(taps, axis=0)  # (kh*kw, C, N, Ho, Wo), built in bf16
    return a.reshape(kh * kw * c, n * ho * wo), (n, ho, wo)


def _conv_bn_lrelu(h_cnhw, w, b, bn, *, stride, negative_slope):
    """Conv2d(3x3, pad=1, bias) [+ eval BatchNorm] [+ LeakyReLU], CNHW in/out."""
    cout, cin, kh, kw = w.shape
    a, (n, ho, wo) = _im2col_cnhw(h_cnhw.astype(jnp.bfloat16), kh, kw, stride, 1)
    # weight -> (Cout, kh*kw*Cin) matching im2col row order (tap-major, c-minor)
    wmat = jnp.transpose(w, (0, 2, 3, 1)).reshape(cout, kh * kw * cin)
    if bn is not None:
        gamma, beta, mean, var = bn
        scale = gamma / jnp.sqrt(var + 1e-5)
        shift = (b - mean) * scale + beta
    else:
        scale = jnp.ones((cout,), jnp.float32)
        shift = b.astype(jnp.float32)
    y = _fused_conv_gemm(wmat, a, scale, shift, negative_slope)
    return y.reshape(cout, n, ho, wo)


@jax.jit
def fc_discriminator_cod(x_nchw, pred_nchw, params):
    """FCDiscriminator_COD.forward (eval-mode BatchNorm)."""
    h = jnp.concatenate([x_nchw, pred_nchw], axis=1)          # (N, 4, H, W)
    h = jnp.transpose(h, (1, 0, 2, 3)).astype(jnp.float32)    # boundary-only NCHW -> CNHW
    h = _conv_bn_lrelu(h, params["conv1_2"]["w"], params["conv1_2"]["b"],
                       params["conv1_2"]["bn"], stride=2, negative_slope=0.2)
    h = _conv_bn_lrelu(h, params["conv2"]["w"], params["conv2"]["b"],
                       params["conv2"]["bn"], stride=1, negative_slope=0.2)
    h = _conv_bn_lrelu(h, params["conv3"]["w"], params["conv3"]["b"],
                       params["conv3"]["bn"], stride=2, negative_slope=0.2)
    h = _conv_bn_lrelu(h, params["conv4"]["w"], params["conv4"]["b"],
                       params["conv4"]["bn"], stride=1, negative_slope=0.2)
    h = _conv_bn_lrelu(h, params["classifier"]["w"], params["classifier"]["b"],
                       None, stride=2, negative_slope=None)   # no BN / no relu
    return jnp.transpose(h, (1, 0, 2, 3))                     # CNHW -> NCHW


# ----------------------------------------------------------------------------
# Demo / self-check
# ----------------------------------------------------------------------------
def _make_params(key, ndf=64):
    layers = [("conv1_2", 4, ndf, True), ("conv2", ndf, ndf, True),
              ("conv3", ndf, ndf, True), ("conv4", ndf, ndf, True),
              ("classifier", ndf, 1, False)]
    params = {}
    for name, cin, cout, has_bn in layers:
        key, kw_, kb_, kg, kbe, km, kv = jax.random.split(key, 7)
        layer = {
            "w": jax.random.normal(kw_, (cout, cin, 3, 3), jnp.float32)
                 / math.sqrt(cin * 9),
            "b": 0.1 * jax.random.normal(kb_, (cout,), jnp.float32),
        }
        if has_bn:
            layer["bn"] = (
                1.0 + 0.1 * jax.random.normal(kg, (cout,), jnp.float32),   # gamma
                0.1 * jax.random.normal(kbe, (cout,), jnp.float32),        # beta
                0.1 * jax.random.normal(km, (cout,), jnp.float32),         # running_mean
                0.5 + jnp.abs(jax.random.normal(kv, (cout,), jnp.float32)),  # running_var
            )
        params[name] = layer
    return params


def _reference(x, pred, params):
    """Pure-JAX (f32, XLA conv) reference with torch Conv2d + eval BN semantics."""
    def conv(h, w, b, stride):
        y = jax.lax.conv_general_dilated(
            h, w, (stride, stride), [(1, 1), (1, 1)],
            dimension_numbers=("NCHW", "OIHW", "NCHW"))
        return y + b[None, :, None, None]

    def bn(h, p):
        g, be, m, v = p
        return ((h - m[None, :, None, None])
                / jnp.sqrt(v[None, :, None, None] + 1e-5)
                * g[None, :, None, None] + be[None, :, None, None])

    def lrelu(h):
        return jnp.where(h > 0, h, 0.2 * h)

    h = jnp.concatenate([x, pred], axis=1)
    for name, stride in (("conv1_2", 2), ("conv2", 1), ("conv3", 2), ("conv4", 1)):
        p = params[name]
        h = lrelu(bn(conv(h, p["w"], p["b"], stride), p["bn"]))
    p = params["classifier"]
    return conv(h, p["w"], p["b"], 2)


if __name__ == "__main__":
    key = jax.random.PRNGKey(0)
    k_p, k_x, k_pred = jax.random.split(key, 3)

    params = _make_params(k_p, ndf=64)
    N, H, W = 2, 16, 16
    x = jax.random.normal(k_x, (N, 3, H, W), jnp.float32)
    pred = jax.random.normal(k_pred, (N, 1, H, W), jnp.float32)

    out = fc_discriminator_cod(x, pred, params)
    out = jax.block_until_ready(out)

    ref = _reference(x, pred, params)
    assert out.shape == ref.shape == (N, 1, 2, 2), out.shape
    rel_err = float(jnp.linalg.norm(out - ref) / (jnp.linalg.norm(ref) + 1e-8))
    assert rel_err < 5e-2, rel_err   # bf16 operands -> ~1-2% expected drift
    print("KERNEL_OK")
</pallas_src>

<mosaic_0001>
module attributes {stable_mosaic.version = 11 : i64} {
  func.func @_conv_gemm_kernel(%arg0: i32, %arg1: memref<64x36xbf16, #tpu.memory_space<vmem>>, %arg2: memref<36x128xbf16, #tpu.memory_space<vmem>>, %arg3: memref<64x1xf32, #tpu.memory_space<vmem>>, %arg4: memref<64x1xf32, #tpu.memory_space<vmem>>, %arg5: memref<64x128xf32, #tpu.memory_space<vmem>>) attributes {dimension_semantics = [#tpu.dimension_semantics<parallel>], iteration_bounds = array<i64: 1>, scalar_prefetch = 0 : i64, scratch_operands = 0 : i64, tpu.core_type = #tpu.core_type<tc>, window_params = [{pipeline_mode = #tpu.pipeline_mode<synchronous>, transform_indices = @transform_0, window_bounds = array<i64: 64, 36>}, {transform_indices = @transform_1, window_bounds = array<i64: 36, 128>}, {pipeline_mode = #tpu.pipeline_mode<synchronous>, transform_indices = @transform_2, window_bounds = array<i64: 64, 1>}, {pipeline_mode = #tpu.pipeline_mode<synchronous>, transform_indices = @transform_3, window_bounds = array<i64: 64, 1>}, {transform_indices = @transform_4, window_bounds = array<i64: 64, 128>}]} {
    %c0 = arith.constant 0 : index
    %c0_0 = arith.constant 0 : index
    %0 = vector.load %arg1[%c0, %c0_0] : memref<64x36xbf16, #tpu.memory_space<vmem>>, vector<64x36xbf16>
    %c0_1 = arith.constant 0 : index
    %c0_2 = arith.constant 0 : index
    %1 = vector.load %arg2[%c0_1, %c0_2] : memref<36x128xbf16, #tpu.memory_space<vmem>>, vector<36x128xbf16>
    %cst = arith.constant dense<0.000000e+00> : vector<64x128xf32>
    %2 = tpu.matmul %0, %1, %cst {dimension_numbers = #tpu.dot_dimension_numbers<[1], [0], [0], [1], [0, 0, 1, 1], [], []>} : vector<64x36xbf16>, vector<36x128xbf16>, vector<64x128xf32> -> vector<64x128xf32>
    %c0_3 = arith.constant 0 : index
    %c0_4 = arith.constant 0 : index
    %3 = vector.load %arg3[%c0_3, %c0_4] : memref<64x1xf32, #tpu.memory_space<vmem>>, vector<64x1xf32>
    %4 = vector.broadcast %3 : vector<64x1xf32> to vector<64x128xf32>
    %5 = arith.mulf %2, %4 : vector<64x128xf32>
    %c0_5 = arith.constant 0 : index
    %c0_6 = arith.constant 0 : index
    %6 = vector.load %arg4[%c0_5, %c0_6] : memref<64x1xf32, #tpu.memory_space<vmem>>, vector<64x1xf32>
    %7 = vector.broadcast %6 : vector<64x1xf32> to vector<64x128xf32>
    %8 = arith.addf %5, %7 : vector<64x128xf32>
    %cst_7 = arith.constant 0.000000e+00 : f32
    %9 = vector.broadcast %cst_7 : f32 to vector<64x128xf32>
    %10 = arith.cmpf ogt, %8, %9 : vector<64x128xf32>
    %cst_8 = arith.constant 2.000000e-01 : f32
    %11 = vector.broadcast %cst_8 : f32 to vector<64x128xf32>
    %12 = arith.mulf %11, %8 : vector<64x128xf32>
    %13 = arith.select %10, %8, %12 : vector<64x128xi1>, vector<64x128xf32>
    %c0_9 = arith.constant 0 : index
    %c0_10 = arith.constant 0 : index
    %14 = vector.load %arg5[%c0_9, %c0_10] : memref<64x128xf32, #tpu.memory_space<vmem>>, vector<64x128xf32>
    tpu.vector_store %arg5[%c0_9, %c0_10], %13 {strides = array<i32>} : memref<64x128xf32, #tpu.memory_space<vmem>>, vector<64x128xf32>,
    return
  }
  func.func @transform_0(%arg0: i32) -> (i32, i32) {
    %c0_i32 = arith.constant 0 : i32
    %c0_i32_0 = arith.constant 0 : i32
    %c0_i32_1 = arith.constant 0 : i32
    return %c0_i32, %c0_i32_0 : i32, i32
  }
  func.func @transform_1(%arg0: i32) -> (i32, i32) {
    %c0_i32 = arith.constant 0 : i32
    %c0_i32_0 = arith.constant 0 : i32
    return %c0_i32, %arg0 : i32, i32
  }
  func.func @transform_2(%arg0: i32) -> (i32, i32) {
    %c0_i32 = arith.constant 0 : i32
    %c0_i32_0 = arith.constant 0 : i32
    %c0_i32_1 = arith.constant 0 : i32
    return %c0_i32, %c0_i32_0 : i32, i32
  }
  func.func @transform_3(%arg0: i32) -> (i32, i32) {
    %c0_i32 = arith.constant 0 : i32
    %c0_i32_0 = arith.constant 0 : i32
    %c0_i32_1 = arith.constant 0 : i32
    return %c0_i32, %c0_i32_0 : i32, i32
  }
  func.func @transform_4(%arg0: i32) -> (i32, i32) {
    %c0_i32 = arith.constant 0 : i32
    %c0_i32_0 = arith.constant 0 : i32
    return %c0_i32, %arg0 : i32, i32
  }
}

module attributes {stable_mosaic.version = 11 : i64} {
  func.func @_conv_gemm_kernel(%arg0: i32, %arg1: memref<64x576xbf16, #tpu.memory_space<vmem>>, %arg2: memref<576x128xbf16, #tpu.memory_space<vmem>>, %arg3: memref<64x1xf32, #tpu.memory_space<vmem>>, %arg4: memref<64x1xf32, #tpu.memory_space<vmem>>, %arg5: memref<64x128xf32, #tpu.memory_space<vmem>>) attributes {dimension_semantics = [#tpu.dimension_semantics<parallel>], iteration_bounds = array<i64: 1>, scalar_prefetch = 0 : i64, scratch_operands = 0 : i64, tpu.core_type = #tpu.core_type<tc>, window_params = [{pipeline_mode = #tpu.pipeline_mode<synchronous>, transform_indices = @transform_0, window_bounds = array<i64: 64, 576>}, {transform_indices = @transform_1, window_bounds = array<i64: 576, 128>}, {pipeline_mode = #tpu.pipeline_mode<synchronous>, transform_indices = @transform_2, window_bounds = array<i64: 64, 1>}, {pipeline_mode = #tpu.pipeline_mode<synchronous>, transform_indices = @transform_3, window_bounds = array<i64: 64, 1>}, {transform_indices = @transform_4, window_bounds = array<i64: 64, 128>}]} {
    %c0 = arith.constant 0 : index
    %c0_0 = arith.constant 0 : index
    %0 = vector.load %arg1[%c0, %c0_0] : memref<64x576xbf16, #tpu.memory_space<vmem>>, vector<64x576xbf16>
    %c0_1 = arith.constant 0 : index
    %c0_2 = arith.constant 0 : index
    %1 = vector.load %arg2[%c0_1, %c0_2] : memref<576x128xbf16, #tpu.memory_space<vmem>>, vector<576x128xbf16>
    %cst = arith.constant dense<0.000000e+00> : vector<64x128xf32>
    %2 = tpu.matmul %0, %1, %cst {dimension_numbers = #tpu.dot_dimension_numbers<[1], [0], [0], [1], [0, 0, 1, 1], [], []>} : vector<64x576xbf16>, vector<576x128xbf16>, vector<64x128xf32> -> vector<64x128xf32>
    %c0_3 = arith.constant 0 : index
    %c0_4 = arith.constant 0 : index
    %3 = vector.load %arg3[%c0_3, %c0_4] : memref<64x1xf32, #tpu.memory_space<vmem>>, vector<64x1xf32>
    %4 = vector.broadcast %3 : vector<64x1xf32> to vector<64x128xf32>
    %5 = arith.mulf %2, %4 : vector<64x128xf32>
    %c0_5 = arith.constant 0 : index
    %c0_6 = arith.constant 0 : index
    %6 = vector.load %arg4[%c0_5, %c0_6] : memref<64x1xf32, #tpu.memory_space<vmem>>, vector<64x1xf32>
    %7 = vector.broadcast %6 : vector<64x1xf32> to vector<64x128xf32>
    %8 = arith.addf %5, %7 : vector<64x128xf32>
    %cst_7 = arith.constant 0.000000e+00 : f32
    %9 = vector.broadcast %cst_7 : f32 to vector<64x128xf32>
    %10 = arith.cmpf ogt, %8, %9 : vector<64x128xf32>
    %cst_8 = arith.constant 2.000000e-01 : f32
    %11 = vector.broadcast %cst_8 : f32 to vector<64x128xf32>
    %12 = arith.mulf %11, %8 : vector<64x128xf32>
    %13 = arith.select %10, %8, %12 : vector<64x128xi1>, vector<64x128xf32>
    %c0_9 = arith.constant 0 : index
    %c0_10 = arith.constant 0 : index
    %14 = vector.load %arg5[%c0_9, %c0_10] : memref<64x128xf32, #tpu.memory_space<vmem>>, vector<64x128xf32>
    tpu.vector_store %arg5[%c0_9, %c0_10], %13 {strides = array<i32>} : memref<64x128xf32, #tpu.memory_space<vmem>>, vector<64x128xf32>,
    return
  }
  func.func @transform_0(%arg0: i32) -> (i32, i32) {
    %c0_i32 = arith.constant 0 : i32
    %c0_i32_0 = arith.constant 0 : i32
    %c0_i32_1 = arith.constant 0 : i32
    return %c0_i32, %c0_i32_0 : i32, i32
  }
  func.func @transform_1(%arg0: i32) -> (i32, i32) {
    %c0_i32 = arith.constant 0 : i32
    %c0_i32_0 = arith.constant 0 : i32
    return %c0_i32, %arg0 : i32, i32
  }
  func.func @transform_2(%arg0: i32) -> (i32, i32) {
    %c0_i32 = arith.constant 0 : i32
    %c0_i32_0 = arith.constant 0 : i32
    %c0_i32_1 = arith.constant 0 : i32
    return %c0_i32, %c0_i32_0 : i32, i32
  }
  func.func @transform_3(%arg0: i32) -> (i32, i32) {
    %c0_i32 = arith.constant 0 : i32
    %c0_i32_0 = arith.constant 0 : i32
    %c0_i32_1 = arith.constant 0 : i32
    return %c0_i32, %c0_i32_0 : i32, i32
  }
  func.func @transform_4(%arg0: i32) -> (i32, i32) {
    %c0_i32 = arith.constant 0 : i32
    %c0_i32_0 = arith.constant 0 : i32
    return %c0_i32, %arg0 : i32, i32
  }
}

module attributes {stable_mosaic.version = 11 : i64} {
  func.func @_conv_gemm_kernel(%arg0: i32, %arg1: memref<64x576xbf16, #tpu.memory_space<vmem>>, %arg2: memref<576x32xbf16, #tpu.memory_space<vmem>>, %arg3: memref<64x1xf32, #tpu.memory_space<vmem>>, %arg4: memref<64x1xf32, #tpu.memory_space<vmem>>, %arg5: memref<64x32xf32, #tpu.memory_space<vmem>>) attributes {dimension_semantics = [#tpu.dimension_semantics<parallel>], iteration_bounds = array<i64: 1>, scalar_prefetch = 0 : i64, scratch_operands = 0 : i64, tpu.core_type = #tpu.core_type<tc>, window_params = [{pipeline_mode = #tpu.pipeline_mode<synchronous>, transform_indices = @transform_0, window_bounds = array<i64: 64, 576>}, {transform_indices = @transform_1, window_bounds = array<i64: 576, 32>}, {pipeline_mode = #tpu.pipeline_mode<synchronous>, transform_indices = @transform_2, window_bounds = array<i64: 64, 1>}, {pipeline_mode = #tpu.pipeline_mode<synchronous>, transform_indices = @transform_3, window_bounds = array<i64: 64, 1>}, {transform_indices = @transform_4, window_bounds = array<i64: 64, 32>}]} {
    %c0 = arith.constant 0 : index
    %c0_0 = arith.constant 0 : index
    %0 = vector.load %arg1[%c0, %c0_0] : memref<64x576xbf16, #tpu.memory_space<vmem>>, vector<64x576xbf16>
    %c0_1 = arith.constant 0 : index
    %c0_2 = arith.constant 0 : index
    %1 = vector.load %arg2[%c0_1, %c0_2] : memref<576x32xbf16, #tpu.memory_space<vmem>>, vector<576x32xbf16>
    %cst = arith.constant dense<0.000000e+00> : vector<64x32xf32>
    %2 = tpu.matmul %0, %1, %cst {dimension_numbers = #tpu.dot_dimension_numbers<[1], [0], [0], [1], [0, 0, 1, 1], [], []>} : vector<64x576xbf16>, vector<576x32xbf16>, vector<64x32xf32> -> vector<64x32xf32>
    %c0_3 = arith.constant 0 : index
    %c0_4 = arith.constant 0 : index
    %3 = vector.load %arg3[%c0_3, %c0_4] : memref<64x1xf32, #tpu.memory_space<vmem>>, vector<64x1xf32>
    %4 = vector.broadcast %3 : vector<64x1xf32> to vector<64x32xf32>
    %5 = arith.mulf %2, %4 : vector<64x32xf32>
    %c0_5 = arith.constant 0 : index
    %c0_6 = arith.constant 0 : index
    %6 = vector.load %arg4[%c0_5, %c0_6] : memref<64x1xf32, #tpu.memory_space<vmem>>, vector<64x1xf32>
    %7 = vector.broadcast %6 : vector<64x1xf32> to vector<64x32xf32>
    %8 = arith.addf %5, %7 : vector<64x32xf32>
    %cst_7 = arith.constant 0.000000e+00 : f32
    %9 = vector.broadcast %cst_7 : f32 to vector<64x32xf32>
    %10 = arith.cmpf ogt, %8, %9 : vector<64x32xf32>
    %cst_8 = arith.constant 2.000000e-01 : f32
    %11 = vector.broadcast %cst_8 : f32 to vector<64x32xf32>
    %12 = arith.mulf %11, %8 : vector<64x32xf32>
    %13 = arith.select %10, %8, %12 : vector<64x32xi1>, vector<64x32xf32>
    %c0_9 = arith.constant 0 : index
    %c0_10 = arith.constant 0 : index
    %14 = vector.load %arg5[%c0_9, %c0_10] : memref<64x32xf32, #tpu.memory_space<vmem>>, vector<64x32xf32>
    tpu.vector_store %arg5[%c0_9, %c0_10], %13 {strides = array<i32>} : memref<64x32xf32, #tpu.memory_space<vmem>>, vector<64x32xf32>,
    return
  }
  func.func @transform_0(%arg0: i32) -> (i32, i32) {
    %c0_i32 = arith.constant 0 : i32
    %c0_i32_0 = arith.constant 0 : i32
    %c0_i32_1 = arith.constant 0 : i32
    return %c0_i32, %c0_i32_0 : i32, i32
  }
  func.func @transform_1(%arg0: i32) -> (i32, i32) {
    %c0_i32 = arith.constant 0 : i32
    %c0_i32_0 = arith.constant 0 : i32
    return %c0_i32, %arg0 : i32, i32
  }
  func.func @transform_2(%arg0: i32) -> (i32, i32) {
    %c0_i32 = arith.constant 0 : i32
    %c0_i32_0 = arith.constant 0 : i32
    %c0_i32_1 = arith.constant 0 : i32
    return %c0_i32, %c0_i32_0 : i32, i32
  }
  func.func @transform_3(%arg0: i32) -> (i32, i32) {
    %c0_i32 = arith.constant 0 : i32
    %c0_i32_0 = arith.constant 0 : i32
    %c0_i32_1 = arith.constant 0 : i32
    return %c0_i32, %c0_i32_0 : i32, i32
  }
  func.func @transform_4(%arg0: i32) -> (i32, i32) {
    %c0_i32 = arith.constant 0 : i32
    %c0_i32_0 = arith.constant 0 : i32
    return %c0_i32, %arg0 : i32, i32
  }
}

module attributes {stable_mosaic.version = 11 : i64} {
  func.func @_conv_gemm_kernel(%arg0: i32, %arg1: memref<1x576xbf16, #tpu.memory_space<vmem>>, %arg2: memref<576x8xbf16, #tpu.memory_space<vmem>>, %arg3: memref<1x1xf32, #tpu.memory_space<vmem>>, %arg4: memref<1x1xf32, #tpu.memory_space<vmem>>, %arg5: memref<1x8xf32, #tpu.memory_space<vmem>>) attributes {dimension_semantics = [#tpu.dimension_semantics<parallel>], iteration_bounds = array<i64: 1>, scalar_prefetch = 0 : i64, scratch_operands = 0 : i64, tpu.core_type = #tpu.core_type<tc>, window_params = [{pipeline_mode = #tpu.pipeline_mode<synchronous>, transform_indices = @transform_0, window_bounds = array<i64: 1, 576>}, {transform_indices = @transform_1, window_bounds = array<i64: 576, 8>}, {pipeline_mode = #tpu.pipeline_mode<synchronous>, transform_indices = @transform_2, window_bounds = array<i64: 1, 1>}, {pipeline_mode = #tpu.pipeline_mode<synchronous>, transform_indices = @transform_3, window_bounds = array<i64: 1, 1>}, {transform_indices = @transform_4, window_bounds = array<i64: 1, 8>}]} {
    %c0 = arith.constant 0 : index
    %c0_0 = arith.constant 0 : index
    %0 = vector.load %arg1[%c0, %c0_0] : memref<1x576xbf16, #tpu.memory_space<vmem>>, vector<1x576xbf16>
    %c0_1 = arith.constant 0 : index
    %c0_2 = arith.constant 0 : index
    %1 = vector.load %arg2[%c0_1, %c0_2] : memref<576x8xbf16, #tpu.memory_space<vmem>>, vector<576x8xbf16>
    %cst = arith.constant dense<0.000000e+00> : vector<1x8xf32>
    %2 = tpu.matmul %0, %1, %cst {dimension_numbers = #tpu.dot_dimension_numbers<[1], [0], [0], [1], [0, 0, 1, 1], [], []>} : vector<1x576xbf16>, vector<576x8xbf16>, vector<1x8xf32> -> vector<1x8xf32>
    %c0_3 = arith.constant 0 : index
    %c0_4 = arith.constant 0 : index
    %3 = vector.load %arg3[%c0_3, %c0_4] : memref<1x1xf32, #tpu.memory_space<vmem>>, vector<1x1xf32>
    %4 = vector.broadcast %3 : vector<1x1xf32> to vector<1x8xf32>
    %5 = arith.mulf %2, %4 : vector<1x8xf32>
    %c0_5 = arith.constant 0 : index
    %c0_6 = arith.constant 0 : index
    %6 = vector.load %arg4[%c0_5, %c0_6] : memref<1x1xf32, #tpu.memory_space<vmem>>, vector<1x1xf32>
    %7 = vector.broadcast %6 : vector<1x1xf32> to vector<1x8xf32>
    %8 = arith.addf %5, %7 : vector<1x8xf32>
    %c0_7 = arith.constant 0 : index
    %c0_8 = arith.constant 0 : index
    %9 = vector.load %arg5[%c0_7, %c0_8] : memref<1x8xf32, #tpu.memory_space<vmem>>, vector<1x8xf32>
    tpu.vector_store %arg5[%c0_7, %c0_8], %8 {strides = array<i32>} : memref<1x8xf32, #tpu.memory_space<vmem>>, vector<1x8xf32>,
    return
  }
  func.func @transform_0(%arg0: i32) -> (i32, i32) {
    %c0_i32 = arith.constant 0 : i32
    %c0_i32_0 = arith.constant 0 : i32
    %c0_i32_1 = arith.constant 0 : i32
    return %c0_i32, %c0_i32_0 : i32, i32
  }
  func.func @transform_1(%arg0: i32) -> (i32, i32) {
    %c0_i32 = arith.constant 0 : i32
    %c0_i32_0 = arith.constant 0 : i32
    return %c0_i32, %arg0 : i32, i32
  }
  func.func @transform_2(%arg0: i32) -> (i32, i32) {
    %c0_i32 = arith.constant 0 : i32
    %c0_i32_0 = arith.constant 0 : i32
    %c0_i32_1 = arith.constant 0 : i32
    return %c0_i32, %c0_i32_0 : i32, i32
  }
  func.func @transform_3(%arg0: i32) -> (i32, i32) {
    %c0_i32 = arith.constant 0 : i32
    %c0_i32_0 = arith.constant 0 : i32
    %c0_i32_1 = arith.constant 0 : i32
    return %c0_i32, %c0_i32_0 : i32, i32
  }
  func.func @transform_4(%arg0: i32) -> (i32, i32) {
    %c0_i32 = arith.constant 0 : i32
    %c0_i32_0 = arith.constant 0 : i32
    return %c0_i32, %arg0 : i32, i32
  }
}

</mosaic_0001>

<bundles_post_ra>
// kernel: fc_discriminator_cod.5
= control target key start
LH: loop header
LB: loop body
LE: loop exit
PB: predicated region body
PF: predicated region fallthrough
CT: control target
= control target key end

     0   :  { %vm79_vm0 = vcmask 1041408   ;;  %vm66_vm1 = vcmask 293888   ;;  %v346_v2 = vmov 0   ;;  %s469_s1 = inlined_call_operand.vmem [shape: bf16[36,128], index: 1, kind: input, shape index: {}]   ;;  %s470_s0 = inlined_call_operand.vmem [shape: bf16[64,36], index: 0, kind: input, shape index: {}]   ;;  %s471_s2 = inlined_call_operand.vmem [shape: f32[64,1], index: 2, kind: input, shape index: {}]   ;;  %s472_s3 = inlined_call_operand.vmem [shape: f32[64,1], index: 3, kind: input, shape index: {}]   ;;  %s473_s4 = inlined_call_operand.vmem [shape: f32[64,128], index: 4, kind: output, shape index: {}]  }
   0x1   :  { %v339_v0 = vld [vmem:[%s469_s1 + $0x10] ss:$0 sps:$4 sm:$0x33]   ;;  %v340_v1 = vld [vmem:[%s469_s1 + $0x8] sm:$0xff]   ;;  %338 = vset.pattern.permute.xlu1 %v346_v2  ;;  %337 = vset.pattern.permute.xlu0 %v346_v2  ;;  %v341_v4 = vld [vmem:[%s469_s1] sm:$0xff]  }
   0x2   :  { %334 = vmatprep.subr.msk.bf16.mxu0 %vm79_vm0, %v339_v0  ;;  %335 = vmatprep.subr.msk.bf16.mxu1 %vm79_vm0, %v339_v0  ;;  %v81_v3 = vsel %vm79_vm0, %v339_v0, 0  ;;  %v342_v5 = vld [vmem:[%s470_s0] sm:$0xff]   ;;  %v343_v6 = vld [vmem:[%s470_s0 + $0x10] sm:$0xff]   ;;  %v344_v9 = vld [vmem:[%s470_s0 + $0x8] sm:$0xff]  }
   0x3   :  { %315 = vmatpush3.bf16.msra.mxu0 %v81_v3  ;;  %331 = vmatpush3.bf16.msra.mxu1 %v81_v3  ;;  %v150_v7 = vld [vmem:[%s471_s2 + $0x10] sm:$0xff]  ;;  %v148_v8 = vld [vmem:[%s471_s2] sm:$0xff]  ;;  %v345_v10 = vld [vmem:[%s470_s0 + $0x18] sm:$0xff]  }
   0x4   :  { %316 = vmatprep.subr.bf16.mxu0 %v340_v1  ;;  %329 = vmatprep.subr.bf16.mxu1 %v340_v1  ;;  %v151_v11 = vld [vmem:[%s471_s2 + $0x18] sm:$0xff]  ;;  %v149_v12 = vld [vmem:[%s471_s2 + $0x8] sm:$0xff]  ;;  %v152_v14 = vld [vmem:[%s471_s2 + $0x20] sm:$0xff] }
   0x5   :  { %320 = vmatprep.mubr.msk.bf16.mxu0 %vm66_vm1, %v342_v5  ;;  %324 = vmatprep.mubr.msk.bf16.mxu1 %vm66_vm1, %v343_v6  ;;  %v153_v13 = vld [vmem:[%s471_s2 + $0x28] sm:$0xff]  ;;  %v155_v15 = vld [vmem:[%s471_s2 + $0x38] sm:$0xff]  ;;  %v154_v16 = vld [vmem:[%s471_s2 + $0x30] sm:$0xff] }
   0x6   :  { %168 = vperm.xlu1 %338, %v150_v7   ;;  %158 = vperm.xlu0 %337, %v148_v8   ;;  %v205_v17 = vld [vmem:[%s472_s3 + $0x8] sm:$0xff]  ;;  %v204_v18 = vld [vmem:[%s472_s3] sm:$0xff]  ;;  %v207_v19 = vld [vmem:[%s472_s3 + $0x18] sm:$0xff] }
   0x7   :  { %317 = vmatpush3.bf16.msra.mxu0 %v340_v1  ;;  %332 = vmatpush3.bf16.msra.mxu1 %v340_v1  ;;  %v206_v20 = vld [vmem:[%s472_s3 + $0x10] sm:$0xff]  ;;  %v209_v21 = vld [vmem:[%s472_s3 + $0x28] sm:$0xff]  ;;  %v208_v22 = vld [vmem:[%s472_s3 + $0x20] sm:$0xff] }
   0x8   :  { %318 = vmatprep.subr.bf16.mxu0 %v341_v4  ;;  %330 = vmatprep.subr.bf16.mxu1 %v341_v4  ;;  %v211_v23 = vld [vmem:[%s472_s3 + $0x38] sm:$0xff]  ;;  %v210_v24 = vld [vmem:[%s472_s3 + $0x30] sm:$0xff] }
   0xa   :  { %173 = vperm.xlu1 %338, %v151_v11   ;;  %163 = vperm.xlu0 %337, %v149_v12  }
   0xb   :  { %319 = vmatpush3.bf16.msra.mxu0 %v341_v4  ;;  %333 = vmatpush3.bf16.msra.mxu1 %v341_v4 }
   0xe   :  { %321 = vmatmul.mubr.msk.bf16.vlgmr.msra.gmra.mxu0 %vm66_vm1, %v344_v9  ;;  %325 = vmatmul.mubr.msk.bf16.vlgmr.msra.gmra.mxu1 %vm66_vm1, %v345_v10 }
   0xf   :  { %183 = vperm.xlu1 %338, %v153_v13   ;;  %178 = vperm.xlu0 %337, %v152_v14  }
  0x13   :  { %193 = vperm.xlu1 %338, %v155_v15   ;;  %188 = vperm.xlu0 %337, %v154_v16  }
  0x17   :  { %219 = vperm.xlu1 %338, %v205_v17   ;;  %214 = vperm.xlu0 %337, %v204_v18  }
  0x1b   :  { %229 = vperm.xlu1 %338, %v207_v19   ;;  %224 = vperm.xlu0 %337, %v206_v20  }
  0x1f   :  { %239 = vperm.xlu1 %338, %v209_v21   ;;  %234 = vperm.xlu0 %337, %v208_v22  }
  0x23   :  { %249 = vperm.xlu1 %338, %v211_v23   ;;  %244 = vperm.xlu0 %337, %v210_v24  }
  0x81   :  { %v159_v25 = vpop.permute.xlu0 %158  ;;  %v169_v26 = vpop.permute.xlu1 %168 }
  0x85   :  { %v164_v27 = vpop.permute.xlu0 %163  ;;  %v174_v28 = vpop.permute.xlu1 %173 }
  0x8a   :  { %v179_v29 = vpop.permute.xlu0 %178  ;;  %v184_v30 = vpop.permute.xlu1 %183 }
  0x8e   :  { %v189_v31 = vpop.permute.xlu0 %188  ;;  %v194_v32 = vpop.permute.xlu1 %193 }
  0x92   :  { %v215_v33 = vpop.permute.xlu0 %214  ;;  %v220_v34 = vpop.permute.xlu1 %219 }
  0x96   :  { %v225_v35 = vpop.permute.xlu0 %224  ;;  %v230_v36 = vpop.permute.xlu1 %229 }
  0x9a   :  { %v235_v37 = vpop.permute.xlu0 %234  ;;  %v240_v40 = vpop.permute.xlu1 %239 }
  0x9e   :  { %v245_v41 = vpop.permute.xlu0 %244  ;;  %v250_v0 = vpop.permute.xlu1 %249 }
  0xce   :  { %v322_v38 = vpop.f32.mrf.mxu0  ;;  %v326_v39 = vpop.f32.mrf.mxu1 }
  0xcf   :  { %v198_v42 = vmul.f32 %v322_v38, %v169_v26  ;;  %v202_v43 = vmul.f32 %v326_v39, %v189_v31 }
  0xd0   :  { %v117_v44 = vpop.f32.mrf.mxu0  ;;  %v133_v45 = vpop.f32.mrf.mxu1 }
  0xd1   :  { %v254_v46 = vadd.f32 %v225_v35, %v198_v42  ;;  %v258_v47 = vadd.f32 %v245_v41, %v202_v43  ;;  %v196_v48 = vmul.f32 %v159_v25, %v117_v44  ;;  %v200_v49 = vmul.f32 %v179_v29, %v133_v45 }
  0xd2   :  { %v323_v50 = vpop.f32.mrf.mxu0  ;;  %v327_v51 = vpop.f32.mrf.mxu1 }
  0xd3   :  { %vm262_vm2 = vcmp.gt.f32.partialorder %v254_v46, 0.0  ;;  %v270_v52 = vmul.f32 0.2, %v254_v46  ;;  %vm266_vm3 = vcmp.gt.f32.partialorder %v258_v47, 0.0  ;;  %v274_v53 = vmul.f32 0.2, %v258_v47 }
  0xd4   :  { %v252_v54 = vadd.f32 %v215_v33, %v196_v48  ;;  %v256_v55 = vadd.f32 %v235_v37, %v200_v49  ;;  %v199_v56 = vmul.f32 %v323_v50, %v174_v28  ;;  %v203_v57 = vmul.f32 %v327_v51, %v194_v32  ;;  %v120_v58 = vpop.f32.mrf.mxu0  ;;  %v136_v59 = vpop.f32.mrf.mxu1 }
  0xd5   :  { %v278_v60 = vsel %vm262_vm2, %v254_v46, %v270_v52  ;;  %v282_v61 = vsel %vm266_vm3, %v258_v47, %v274_v53  ;;  %v197_v62 = vmul.f32 %v164_v27, %v120_v58  ;;  %v201_v63 = vmul.f32 %v184_v30, %v136_v59 }
  0xd6   :  { %286 = vst [vmem:[%s473_s4 + $0x10] sm:$0xff] %v278_v60  ;;  %290 = vst [vmem:[%s473_s4 + $0x30] sm:$0xff] %v282_v61  ;;  %vm260_vm4 = vcmp.gt.f32.partialorder %v252_v54, 0.0  ;;  %v268_v1 = vmul.f32 0.2, %v252_v54  ;;  %vm264_vm5 = vcmp.gt.f32.partialorder %v256_v55, 0.0  ;;  %v255_v3 = vadd.f32 %v230_v36, %v199_v56 }
  0xd7   :  { %v272_v2 = vmul.f32 0.2, %v256_v55  ;;  %v259_v4 = vadd.f32 %v250_v0, %v203_v57  ;;  %v253_v5 = vadd.f32 %v220_v34, %v197_v62  ;;  %v257_v6 = vadd.f32 %v240_v40, %v201_v63 }
  0xd8   :  { %v276_v7 = vsel %vm260_vm4, %v252_v54, %v268_v1  ;;  %vm263_vm6 = vcmp.gt.f32.partialorder %v255_v3, 0.0  ;;  %v271_v9 = vmul.f32 0.2, %v255_v3 }
  0xd9   :  { %v280_v8 = vsel %vm264_vm5, %v256_v55, %v272_v2  ;;  %284 = vst [vmem:[%s473_s4] sm:$0xff] %v276_v7  ;;  %vm267_vm7 = vcmp.gt.f32.partialorder %v259_v4, 0.0  ;;  %v275_v10 = vmul.f32 0.2, %v259_v4  ;;  %vm261_vm8 = vcmp.gt.f32.partialorder %v253_v5, 0.0 }
  0xda   :  { %288 = vst [vmem:[%s473_s4 + $0x20] sm:$0xff] %v280_v8  ;;  %v269_v11 = vmul.f32 0.2, %v253_v5  ;;  %vm265_vm9 = vcmp.gt.f32.partialorder %v257_v6, 0.0  ;;  %v273_v12 = vmul.f32 0.2, %v257_v6  ;;  %v279_v13 = vsel %vm263_vm6, %v255_v3, %v271_v9 }
  0xdb   :  { %v283_v14 = vsel %vm267_vm7, %v259_v4, %v275_v10  ;;  %287 = vst [vmem:[%s473_s4 + $0x18] sm:$0xff] %v279_v13 }
  0xdc   :  { %291 = vst [vmem:[%s473_s4 + $0x38] sm:$0xff] %v283_v14  ;;  %v277_v15 = vsel %vm261_vm8, %v253_v5, %v269_v11  ;;  %v281_v16 = vsel %vm265_vm9, %v257_v6, %v273_v12 }
  0xdd   :  { %285 = vst [vmem:[%s473_s4 + $0x8] sm:$0xff] %v277_v15  ;;  %289 = vst [vmem:[%s473_s4 + $0x28] sm:$0xff] %v281_v16 }

// kernel: fc_discriminator_cod.6
= control target key start
LH: loop header
LB: loop body
LE: loop exit
PB: predicated region body
PF: predicated region fallthrough
CT: control target
= control target key end

     0   :  { %v1025_v1 = vmov 0   ;;  %vm430_vm0 = vcmask 523264   ;;  %s1322_s1 = inlined_call_operand.vmem [shape: bf16[576,128], index: 1, kind: input, shape index: {}]   ;;  %s1323_s0 = inlined_call_operand.vmem [shape: bf16[64,576], index: 0, kind: input, shape index: {}]   ;;  %s1324_s2 = inlined_call_operand.vmem [shape: f32[64,1], index: 2, kind: input, shape index: {}]   ;;  %s1325_s3 = inlined_call_operand.vmem [shape: f32[64,1], index: 3, kind: input, shape index: {}]   ;;  %s1326_s4 = inlined_call_operand.vmem [shape: f32[64,128], index: 4, kind: output, shape index: {}]  }
   0x1   :  { %v961_v0 = vld [vmem:[%s1322_s1 + $0x78] sm:$0xff]   ;;  %960 = vset.pattern.permute.xlu1 %v1025_v1  ;;  %959 = vset.pattern.permute.xlu0 %v1025_v1  ;;  %v965_v5 = vld [vmem:[%s1322_s1 + $0x70] sm:$0xff]   ;;  %v969_v9 = vld [vmem:[%s1322_s1 + $0x68] sm:$0xff]  }
   0x2   :  { %v962_v2 = vld [vmem:[%s1322_s1 + $0xf8] sm:$0xff]   ;;  %846 = vmatprep.subr.bf16.mxu0 %v961_v0  ;;  %v966_v6 = vld [vmem:[%s1322_s1 + $0xf0] sm:$0xff]   ;;  %v970_v10 = vld [vmem:[%s1322_s1 + $0xe8] sm:$0xff]  }
   0x3   :  { %v963_v3 = vld [vmem:[%s1322_s1 + $0x38] sm:$0xff]   ;;  %886 = vmatprep.subr.bf16.mxu1 %v962_v2  ;;  %v967_v7 = vld [vmem:[%s1322_s1 + $0x30] sm:$0xff]   ;;  %v971_v11 = vld [vmem:[%s1322_s1 + $0x28] sm:$0xff]  }
   0x4   :  { %v964_v4 = vld [vmem:[%s1322_s1 + $0xb8] sm:$0xff]   ;;  %847 = vmatpush3.bf16.msra.mxu0 %v963_v3  ;;  %v968_v8 = vld [vmem:[%s1322_s1 + $0xb0] sm:$0xff]   ;;  %v972_v12 = vld [vmem:[%s1322_s1 + $0xa8] sm:$0xff]  }
   0x5   :  { %887 = vmatpush3.bf16.msra.mxu1 %v964_v4  ;;  %848 = vmatprep.subr.bf16.mxu0 %v965_v5  ;;  %v973_v13 = vld [vmem:[%s1322_s1 + $0x60] sm:$0xff]   ;;  %v977_v17 = vld [vmem:[%s1322_s1 + $0x58] sm:$0xff]   ;;  %v981_v21 = vld [vmem:[%s1322_s1 + $0x50] sm:$0xff]  }
   0x6   :  { %888 = vmatprep.subr.bf16.mxu1 %v966_v6  ;;  %v974_v14 = vld [vmem:[%s1322_s1 + $0xe0] sm:$0xff]   ;;  %v978_v18 = vld [vmem:[%s1322_s1 + $0xd8] sm:$0xff]   ;;  %v982_v22 = vld [vmem:[%s1322_s1 + $0xd0] sm:$0xff]  }
   0x7   :  { %v975_v15 = vld [vmem:[%s1322_s1 + $0x20] sm:$0xff]   ;;  %v979_v19 = vld [vmem:[%s1322_s1 + $0x18] sm:$0xff]   ;;  %v983_v23 = vld [vmem:[%s1322_s1 + $0x10] sm:$0xff]  }
   0x8   :  { %849 = vmatpush3.bf16.msra.mxu0 %v967_v7  ;;  %v976_v16 = vld [vmem:[%s1322_s1 + $0xa0] sm:$0xff]   ;;  %v980_v20 = vld [vmem:[%s1322_s1 + $0x98] sm:$0xff]   ;;  %v984_v24 = vld [vmem:[%s1322_s1 + $0x90] sm:$0xff]  }
   0x9   :  { %889 = vmatpush3.bf16.msra.mxu1 %v968_v8  ;;  %850 = vmatprep.subr.bf16.mxu0 %v969_v9  ;;  %v985_v25 = vld [vmem:[%s1322_s1 + $0x48] sm:$0xff]   ;;  %v989_v29 = vld [vmem:[%s1322_s1 + $0x40] sm:$0xff]   ;;  %v999_v37 = vld [vmem:[%s1322_s1 + $0x118] sm:$0xff]  }
   0xa   :  { %890 = vmatprep.subr.bf16.mxu1 %v970_v10  ;;  %v986_v26 = vld [vmem:[%s1322_s1 + $0xc8] sm:$0xff]   ;;  %v990_v30 = vld [vmem:[%s1322_s1 + $0xc0] sm:$0xff]   ;;  %v1006_v40 = vld [vmem:[%s1322_s1 + $0x110] sm:$0xff]  }
   0xb   :  { %v987_v27 = vld [vmem:[%s1322_s1 + $0x8] sm:$0xff]   ;;  %v991_v31 = vld [vmem:[%s1322_s1] sm:$0xff]   ;;  %v1009_v44 = vld [vmem:[%s1323_s0 + $0x5c] ss:$20 sps:$4 sm:$0xff]  }
   0xc   :  { %851 = vmatpush3.bf16.msra.mxu0 %v971_v11  ;;  %v988_v28 = vld [vmem:[%s1322_s1 + $0x88] sm:$0xff]   ;;  %v992_v32 = vld [vmem:[%s1322_s1 + $0x80] sm:$0xff]   ;;  %v1014_v49 = vld [vmem:[%s1323_s0 + $0x7c] ss:$20 sps:$4 sm:$0xff]  }
   0xd   :  { %891 = vmatpush3.bf16.msra.mxu1 %v972_v12  ;;  %852 = vmatprep.subr.bf16.mxu0 %v973_v13  ;;  %v993_v33 = vld [vmem:[%s1323_s0] ss:$20 sps:$4 sm:$0xff]   ;;  %v995_v34 = vld [vmem:[%s1323_s0 + $0x4] ss:$20 sps:$4 sm:$0xff]   ;;  %v996_v35 = vld [vmem:[%s1323_s0 + $0x8] ss:$20 sps:$4 sm:$0xff]  }
   0xe   :  { %892 = vmatprep.subr.bf16.mxu1 %v974_v14  ;;  %v998_v36 = vld [vmem:[%s1323_s0 + $0xc] ss:$20 sps:$4 sm:$0xff]   ;;  %475 = vmatprep.mubr.bf16.mxu0 %v995_v34  ;;  %v1002_v39 = vld [vmem:[%s1323_s0 + $0x34] ss:$20 sps:$4 sm:$0xff]   ;;  %v1005_v42 = vld [vmem:[%s1323_s0 + $0x30] ss:$20 sps:$4 sm:$0xff]  }
   0xf   :  { %540 = vmatprep.mubr.bf16.mxu1 %v998_v36  ;;  %v1000_v38 = vld [vmem:[%s1323_s0 + $0x2c] ss:$20 sps:$4 sm:$0xff]   ;;  %v1004_v41 = vld [vmem:[%s1323_s0 + $0x28] ss:$20 sps:$4 sm:$0xff]   ;;  %v1011_v47 = vld [vmem:[%s1323_s0 + $0x50] ss:$20 sps:$4 sm:$0xff]  }
  0x10   :  { %853 = vmatpush3.bf16.msra.mxu0 %v975_v15  ;;  %v1007_v43 = vld [vmem:[%s1323_s0 + $0x54] ss:$20 sps:$4 sm:$0xff]   ;;  %v1020_v46 = vld [vmem:[%s1322_s1 + $0x100] sm:$0xff]   ;;  %v1012_v48 = vld [vmem:[%s1323_s0 + $0x58] ss:$20 sps:$4 sm:$0xff]  }
  0x11   :  { %893 = vmatpush3.bf16.msra.mxu1 %v976_v16  ;;  %854 = vmatprep.subr.bf16.mxu0 %v977_v17  ;;  %v1013_v45 = vld [vmem:[%s1322_s1 + $0x108] sm:$0xff]   ;;  %v1016_v50 = vld [vmem:[%s1323_s0 + $0x84] ss:$20 sps:$4 sm:$0xff]   ;;  %v640_v51 = vld [vmem:[%s1324_s2 + $0x10] sm:$0xff] }
  0x12   :  { %894 = vmatprep.subr.bf16.mxu1 %v978_v18  ;;  %v638_v52 = vld [vmem:[%s1324_s2] sm:$0xff]  ;;  %658 = vperm.xlu1 %960, %v640_v51   ;;  %v641_v53 = vld [vmem:[%s1324_s2 + $0x18] sm:$0xff]  ;;  %v639_v54 = vld [vmem:[%s1324_s2 + $0x8] sm:$0xff] }
  0x13   :  { %648 = vperm.xlu0 %959, %v638_v52   ;;  %v1018_v55 = vld [vmem:[%s1323_s0 + $0x78] ss:$20 sps:$4 sm:$0xff]   ;;  %v1019_v56 = vld [vmem:[%s1323_s0 + $0x80] ss:$20 sps:$4 sm:$0xff]   ;;  %v1021_v57 = vld [vmem:[%s1323_s0 + $0x10] ss:$20 sps:$4 sm:$0xff]  }
  0x14   :  { %855 = vmatpush3.bf16.msra.mxu0 %v979_v19  ;;  %v643_v58 = vld [vmem:[%s1324_s2 + $0x28] sm:$0xff]  ;;  %v1022_v59 = vld [vmem:[%s1323_s0 + $0x60] ss:$20 sps:$4 sm:$0xff]   ;;  %v645_v61 = vld [vmem:[%s1324_s2 + $0x38] sm:$0xff] }
  0x15   :  { %895 = vmatpush3.bf16.msra.mxu1 %v980_v20  ;;  %856 = vmatprep.subr.bf16.mxu0 %v981_v21  ;;  %v642_v60 = vld [vmem:[%s1324_s2 + $0x20] sm:$0xff]  ;;  %v644_v62 = vld [vmem:[%s1324_s2 + $0x30] sm:$0xff]  ;;  %v1023_v63 = vld [vmem:[%s1323_s0 + $0x38] ss:$20 sps:$4 sm:$0xff]  }
  0x16   :  { %896 = vmatprep.subr.bf16.mxu1 %v982_v22  ;;  %663 = vperm.xlu1 %960, %v641_v53   ;;  %v1024_v0 = vld [vmem:[%s1323_s0 + $0x88] ss:$20 sps:$4 sm:$0xff]   ;;  %v694_v2 = vld [vmem:[%s1325_s3] sm:$0xff]  ;;  %v696_v4 = vld [vmem:[%s1325_s3 + $0x10] sm:$0xff] }
  0x17   :  { %653 = vperm.xlu0 %959, %v639_v54   ;;  %v695_v1 = vld [vmem:[%s1325_s3 + $0x8] sm:$0xff]  ;;  %v697_v3 = vld [vmem:[%s1325_s3 + $0x18] sm:$0xff]  ;;  %v698_v6 = vld [vmem:[%s1325_s3 + $0x20] sm:$0xff] }
  0x18   :  { %857 = vmatpush3.bf16.msra.mxu0 %v983_v23  ;;  %v699_v5 = vld [vmem:[%s1325_s3 + $0x28] sm:$0xff]  ;;  %v701_v7 = vld [vmem:[%s1325_s3 + $0x38] sm:$0xff]  ;;  %v700_v8 = vld [vmem:[%s1325_s3 + $0x30] sm:$0xff] }
  0x19   :  { %897 = vmatpush3.bf16.msra.mxu1 %v984_v24  ;;  %858 = vmatprep.subr.bf16.mxu0 %v985_v25 }
  0x1a   :  { %898 = vmatprep.subr.bf16.mxu1 %v986_v26  ;;  %673 = vperm.xlu1 %960, %v643_v58  }
  0x1b   :  { %668 = vperm.xlu0 %959, %v642_v60  }
  0x1c   :  { %859 = vmatpush3.bf16.msra.mxu0 %v987_v27 }
  0x1d   :  { %899 = vmatpush3.bf16.msra.mxu1 %v988_v28  ;;  %860 = vmatprep.subr.bf16.mxu0 %v989_v29 }
  0x1e   :  { %900 = vmatprep.subr.bf16.mxu1 %v990_v30  ;;  %683 = vperm.xlu1 %960, %v645_v61  }
  0x1f   :  { %678 = vperm.xlu0 %959, %v644_v62  }
  0x20   :  { %861 = vmatpush3.bf16.msra.mxu0 %v991_v31 }
  0x21   :  { %901 = vmatpush3.bf16.msra.mxu1 %v992_v32  ;;  %934 = vmatprep.subr.bf16.mxu0 %v999_v37 }
  0x22   :  { %950 = vmatprep.subr.bf16.mxu1 %v999_v37  ;;  %709 = vperm.xlu1 %960, %v695_v1  }
  0x23   :  { %476 = vmatmul.mubr.bf16.vlgmr.msra.gmra.mxu0 %v993_v33  ;;  %704 = vperm.xlu0 %959, %v694_v2  }
  0x24   :  { %541 = vmatmul.mubr.bf16.vlgmr.msra.gmra.mxu1 %v996_v35  ;;  %935 = vmatpush3.bf16.msra.mxu0 %v999_v37 }
  0x25   :  { %954 = vmatpush3.bf16.msra.mxu1 %v999_v37  ;;  %483 = vmatprep.mubr.bf16.mxu0 %v1000_v38 }
  0x26   :  { %548 = vmatprep.mubr.bf16.mxu1 %v1002_v39  ;;  %936 = vmatprep.subr.bf16.mxu0 %v1006_v40 }
  0x27   :  { %951 = vmatprep.subr.bf16.mxu1 %v1006_v40  ;;  %719 = vperm.xlu1 %960, %v697_v3  }
  0x28   :  { %937 = vmatpush3.bf16.msra.mxu0 %v1006_v40  ;;  %714 = vperm.xlu0 %959, %v696_v4  }
  0x29   :  { %955 = vmatpush3.bf16.msra.mxu1 %v1006_v40  ;;  %938 = vmatprep.subr.bf16.mxu0 %v1013_v45 }
  0x2a   :  { %952 = vmatprep.subr.bf16.mxu1 %v1013_v45 }
  0x2b   :  { %484 = vmatmul.mubr.bf16.gmra.mxu0 %v1004_v41  ;;  %729 = vperm.xlu1 %960, %v699_v5  }
  0x2c   :  { %549 = vmatmul.mubr.bf16.gmra.mxu1 %v1005_v42  ;;  %491 = vmatprep.mubr.bf16.mxu0 %v1007_v43 }
  0x2d   :  { %556 = vmatprep.mubr.bf16.mxu1 %v1009_v44  ;;  %939 = vmatpush3.bf16.msra.mxu0 %v1013_v45 }
  0x2e   :  { %956 = vmatpush3.bf16.msra.mxu1 %v1013_v45  ;;  %940 = vmatprep.subr.bf16.mxu0 %v1020_v46 }
  0x2f   :  { %953 = vmatprep.subr.bf16.mxu1 %v1020_v46  ;;  %724 = vperm.xlu0 %959, %v698_v6  }
  0x30   :  { %739 = vperm.xlu1 %960, %v701_v7  }
  0x31   :  { %941 = vmatpush3.bf16.msra.mxu0 %v1020_v46 }
  0x32   :  { %957 = vmatpush3.bf16.msra.mxu1 %v1020_v46 }
  0x33   :  { %492 = vmatmul.mubr.bf16.gmra.mxu0 %v1011_v47  ;;  %734 = vperm.xlu0 %959, %v700_v8  }
  0x34   :  { %557 = vmatmul.mubr.bf16.gmra.mxu1 %v1012_v48  ;;  %499 = vmatprep.mubr.bf16.mxu0 %v1014_v49 }
  0x35   :  { %564 = vmatprep.mubr.bf16.mxu1 %v1016_v50 }
  0x3b   :  { %500 = vmatmul.mubr.bf16.gmra.mxu0 %v1018_v55 }
  0x3c   :  { %565 = vmatmul.mubr.bf16.gmra.mxu1 %v1019_v56  ;;  %942 = vmatprep.mubr.msk.bf16.mxu0 %vm430_vm0, %v1021_v57 }
  0x3d   :  { %946 = vmatprep.mubr.msk.bf16.mxu1 %vm430_vm0, %v1022_v59 }
  0x43   :  { %943 = vmatmul.mubr.msk.bf16.vlgmr.msra.gmra.mxu0 %vm430_vm0, %v1023_v63 }
  0x44   :  { %947 = vmatmul.mubr.msk.bf16.vlgmr.msra.gmra.mxu1 %vm430_vm0, %v1024_v0 }
  0x8d   :  { %v1273_v10 = vpop.permute.xlu1 %658 }
  0x8e   :  { %v1271_v9 = vpop.permute.xlu0 %648 }
  0x91   :  { %v1277_v17 = vpop.permute.xlu1 %663 }
  0x92   :  { %v1275_v12 = vpop.permute.xlu0 %653 }
  0x95   :  { %v1281_v25 = vpop.permute.xlu1 %673 }
  0x96   :  { %v1279_v20 = vpop.permute.xlu0 %668 }
  0x99   :  { %v1283_v33 = vpop.permute.xlu1 %683 }
  0x9a   :  { %v679_v28 = vpop.permute.xlu0 %678 }
  0x9d   :  { %v1287_v41 = vpop.permute.xlu1 %709 }
  0x9e   :  { %v1285_v36 = vpop.permute.xlu0 %704 }
  0xa2   :  { %v720_v55 = vpop.permute.xlu1 %719 }
  0xa3   :  { %v715_v44 = vpop.permute.xlu0 %714 }
  0xaa   :  { %v725_v60 = vpop.permute.xlu0 %724 }
  0xe3   :  { %v862_v11 = vpop.f32.mrf.mxu0 }
  0xe4   :  { %v902_v13 = vpop.f32.mrf.mxu1 }
  0xe5   :  { %v863_v14 = vpop.f32.mrf.mxu0 }
  0xe6   :  { %v903_v15 = vpop.f32.mrf.mxu1  ;;  %v864_v53 = vadd.f32 %v863_v14, %v862_v11 }
  0xe7   :  { %v865_v16 = vpop.f32.mrf.mxu0  ;;  %v904_v54 = vadd.f32 %v903_v15, %v902_v13 }
  0xe8   :  { %v905_v18 = vpop.f32.mrf.mxu1 }
  0xe9   :  { %v866_v19 = vpop.f32.mrf.mxu0  ;;  %v543_v11 = vadd.f32 %v904_v54, %v864_v53 }
  0xea   :  { %v906_v21 = vpop.f32.mrf.mxu1  ;;  %v867_v5 = vadd.f32 %v866_v19, %v865_v16  ;;  %v735_v16 = vpop.permute.xlu0 %734 }
  0xeb   :  { %v868_v22 = vpop.f32.mrf.mxu0  ;;  %v907_v6 = vadd.f32 %v906_v21, %v905_v18 }
  0xec   :  { %v908_v23 = vpop.f32.mrf.mxu1 }
  0xed   :  { %v869_v24 = vpop.f32.mrf.mxu0 }
  0xee   :  { %v909_v26 = vpop.f32.mrf.mxu1  ;;  %v870_v47 = vadd.f32 %v869_v24, %v868_v22  ;;  %v730_v24 = vpop.permute.xlu1 %729 }
  0xef   :  { %v871_v27 = vpop.f32.mrf.mxu0  ;;  %v910_v48 = vadd.f32 %v909_v26, %v908_v23 }
  0xf0   :  { %v911_v29 = vpop.f32.mrf.mxu1 }
  0xf1   :  { %v872_v30 = vpop.f32.mrf.mxu0  ;;  %v551_v0 = vadd.f32 %v910_v48, %v870_v47 }
  0xf2   :  { %v912_v31 = vpop.f32.mrf.mxu1  ;;  %v873_v61 = vadd.f32 %v872_v30, %v871_v27  ;;  %v740_v48 = vpop.permute.xlu1 %739 }
  0xf3   :  { %v874_v32 = vpop.f32.mrf.mxu0  ;;  %v913_v62 = vadd.f32 %v912_v31, %v911_v29 }
  0xf4   :  { %v914_v34 = vpop.f32.mrf.mxu1 }
  0xf5   :  { %v875_v35 = vpop.f32.mrf.mxu0  ;;  %v554_v30 = vadd.f32 %v913_v62, %v873_v61 }
  0xf6   :  { %v915_v37 = vpop.f32.mrf.mxu1  ;;  %v876_v57 = vadd.f32 %v875_v35, %v874_v32 }
  0xf7   :  { %v877_v38 = vpop.f32.mrf.mxu0  ;;  %v916_v58 = vadd.f32 %v915_v37, %v914_v34 }
  0xf8   :  { %v917_v39 = vpop.f32.mrf.mxu1 }
  0xf9   :  { %v878_v40 = vpop.f32.mrf.mxu0  ;;  %v559_v23 = vadd.f32 %v916_v58, %v876_v57 }
  0xfa   :  { %v918_v42 = vpop.f32.mrf.mxu1  ;;  %v879_v13 = vadd.f32 %v878_v40, %v877_v38  ;;  %v546_v38 = vadd.f32 %v907_v6, %v867_v5 }
  0xfb   :  { %v880_v43 = vpop.f32.mrf.mxu0  ;;  %v919_v14 = vadd.f32 %v918_v42, %v917_v39 }
  0xfc   :  { %v920_v45 = vpop.f32.mrf.mxu1 }
  0xfd   :  { %v881_v46 = vpop.f32.mrf.mxu0 }
  0xfe   :  { %v921_v49 = vpop.f32.mrf.mxu1  ;;  %v882_v50 = vadd.f32 %v881_v46, %v880_v43  ;;  %v562_v43 = vadd.f32 %v919_v14, %v879_v13 }
  0xff   :  { %v922_v51 = vadd.f32 %v921_v49, %v920_v45  ;;  %v883_v52 = vpop.f32.mrf.mxu0 }
 0x100   :  { %v923_v56 = vpop.f32.mrf.mxu1 }
 0x101   :  { %v884_v59 = vpop.f32.mrf.mxu0  ;;  %v567_v4 = vadd.f32 %v922_v51, %v882_v50 }
 0x102   :  { %v924_v63 = vpop.f32.mrf.mxu1  ;;  %v885_v1 = vadd.f32 %v884_v59, %v883_v52 }
 0x103   :  { %v925_v2 = vadd.f32 %v924_v63, %v923_v56  ;;  %v944_v3 = vpop.f32.mrf.mxu0 }
 0x104   :  { %v616_v7 = vadd.f32 %v944_v3, %v551_v0  ;;  %v948_v8 = vpop.f32.mrf.mxu1 }
 0x105   :  { %v632_v15 = vadd.f32 %v948_v8, %v567_v4  ;;  %v607_v22 = vpop.f32.mrf.mxu0  ;;  %v570_v35 = vadd.f32 %v925_v2, %v885_v1 }
 0x106   :  { %v688_v26 = vmul.f32 %v1273_v10, %v616_v7  ;;  %v608_v27 = vadd.f32 %v607_v22, %v543_v11  ;;  %v623_v29 = vpop.f32.mrf.mxu1 }
 0x107   :  { %v692_v31 = vmul.f32 %v679_v28, %v632_v15  ;;  %v624_v32 = vadd.f32 %v623_v29, %v559_v23  ;;  %v945_v34 = vpop.f32.mrf.mxu0 }
 0x108   :  { %v744_v18 = vadd.f32 %v715_v44, %v688_v26  ;;  %v686_v19 = vmul.f32 %v1271_v9, %v608_v27  ;;  %v619_v21 = vadd.f32 %v945_v34, %v554_v30  ;;  %v949_v37 = vpop.f32.mrf.mxu1 }
 0x109   :  { %v748_v39 = vadd.f32 %v735_v16, %v692_v31  ;;  %v690_v40 = vmul.f32 %v1279_v20, %v624_v32  ;;  %v635_v42 = vadd.f32 %v949_v37, %v570_v35  ;;  %v610_v9 = vpop.f32.mrf.mxu0 }
 0x10a   :  { %vm752_vm1 = vcmp.gt.f32.partialorder %v744_v18, 0.0  ;;  %v760_v10 = vmul.f32 0.2, %v744_v18  ;;  %v742_v45 = vadd.f32 %v1285_v36, %v686_v19  ;;  %v689_v28 = vmul.f32 %v1277_v17, %v619_v21  ;;  %v626_v20 = vpop.f32.mrf.mxu1 }
 0x10b   :  { %vm756_vm2 = vcmp.gt.f32.partialorder %v748_v39, 0.0  ;;  %v764_v46 = vmul.f32 0.2, %v748_v39  ;;  %v746_v47 = vadd.f32 %v725_v60, %v690_v40  ;;  %v693_v44 = vmul.f32 %v1283_v33, %v635_v42 }
 0x10c   :  { %v768_v49 = vsel %vm752_vm1, %v744_v18, %v760_v10  ;;  %vm750_vm3 = vcmp.gt.f32.partialorder %v742_v45, 0.0  ;;  %v758_v50 = vmul.f32 0.2, %v742_v45  ;;  %v745_v51 = vadd.f32 %v720_v55, %v689_v28 }
 0x10d   :  { %776 = vst [vmem:[%s1326_s4 + $0x10] sm:$0xff] %v768_v49  ;;  %v772_v52 = vsel %vm756_vm2, %v748_v39, %v764_v46  ;;  %vm754_vm4 = vcmp.gt.f32.partialorder %v746_v47, 0.0  ;;  %v762_v36 = vmul.f32 0.2, %v746_v47  ;;  %v749_v17 = vadd.f32 %v740_v48, %v693_v44 }
 0x10e   :  { %780 = vst [vmem:[%s1326_s4 + $0x30] sm:$0xff] %v772_v52  ;;  %v766_v33 = vsel %vm750_vm3, %v742_v45, %v758_v50  ;;  %vm753_vm5 = vcmp.gt.f32.partialorder %v745_v51, 0.0  ;;  %v761_v53 = vmul.f32 0.2, %v745_v51  ;;  %v611_v54 = vadd.f32 %v610_v9, %v546_v38 }
 0x10f   :  { %774 = vst [vmem:[%s1326_s4] sm:$0xff] %v766_v33  ;;  %v770_v55 = vsel %vm754_vm4, %v746_v47, %v762_v36  ;;  %vm757_vm6 = vcmp.gt.f32.partialorder %v749_v17, 0.0  ;;  %v765_v56 = vmul.f32 0.2, %v749_v17  ;;  %v627_v57 = vadd.f32 %v626_v20, %v562_v43 }
 0x110   :  { %778 = vst [vmem:[%s1326_s4 + $0x20] sm:$0xff] %v770_v55  ;;  %v769_v58 = vsel %vm753_vm5, %v745_v51, %v761_v53  ;;  %v687_v59 = vmul.f32 %v1275_v12, %v611_v54 }
 0x111   :  { %777 = vst [vmem:[%s1326_s4 + $0x18] sm:$0xff] %v769_v58  ;;  %v773_v60 = vsel %vm757_vm6, %v749_v17, %v765_v56  ;;  %v691_v61 = vmul.f32 %v1281_v25, %v627_v57 }
 0x112   :  { %781 = vst [vmem:[%s1326_s4 + $0x38] sm:$0xff] %v773_v60  ;;  %v743_v62 = vadd.f32 %v1287_v41, %v687_v59 }
 0x113   :  { %v747_v63 = vadd.f32 %v730_v24, %v691_v61 }
 0x114   :  { %vm751_vm7 = vcmp.gt.f32.partialorder %v743_v62, 0.0  ;;  %v759_v0 = vmul.f32 0.2, %v743_v62 }
 0x115   :  { %vm755_vm8 = vcmp.gt.f32.partialorder %v747_v63, 0.0  ;;  %v763_v1 = vmul.f32 0.2, %v747_v63 }
 0x116   :  { %v767_v2 = vsel %vm751_vm7, %v743_v62, %v759_v0 }
 0x117   :  { %775 = vst [vmem:[%s1326_s4 + $0x8] sm:$0xff] %v767_v2  ;;  %v771_v12 = vsel %vm755_vm8, %v747_v63, %v763_v1 }
 0x118   :  { %779 = vst [vmem:[%s1326_s4 + $0x28] sm:$0xff] %v771_v12 }

// kernel: fc_discriminator_cod.7
= control target key start
LH: loop header
LB: loop body
LE: loop exit
PB: predicated region body
PF: predicated region fallthrough
CT: control target
= control target key end

     0   :  { %v1026_v1 = vmov 0   ;;  %vm430_vm0 = vcmask 523264   ;;  %vm774_vm1 = vcmask 261120   ;;  %s1331_s1 = inlined_call_operand.vmem [shape: bf16[576,32], index: 1, kind: input, shape index: {}]   ;;  %s1332_s0 = inlined_call_operand.vmem [shape: bf16[64,576], index: 0, kind: input, shape index: {}]   ;;  %s1333_s2 = inlined_call_operand.vmem [shape: f32[64,1], index: 2, kind: input, shape index: {}]   ;;  %s1334_s3 = inlined_call_operand.vmem [shape: f32[64,1], index: 3, kind: input, shape index: {}]   ;;  %s1335_s4 = inlined_call_operand.vmem [shape: f32[64,32], index: 4, kind: output, shape index: {}]  }
   0x1   :  { %v962_v0 = vld [vmem:[%s1331_s1 + $0x78] sm:$0xff]   ;;  %961 = vset.pattern.permute.xlu1 %v1026_v1  ;;  %960 = vset.pattern.permute.xlu0 %v1026_v1  ;;  %v966_v5 = vld [vmem:[%s1331_s1 + $0x70] sm:$0xff]   ;;  %v970_v9 = vld [vmem:[%s1331_s1 + $0x68] sm:$0xff]  }
   0x2   :  { %v963_v2 = vld [vmem:[%s1331_s1 + $0xf8] sm:$0xff]   ;;  %847 = vmatprep.subr.bf16.mxu0 %v962_v0  ;;  %v967_v6 = vld [vmem:[%s1331_s1 + $0xf0] sm:$0xff]   ;;  %v971_v10 = vld [vmem:[%s1331_s1 + $0xe8] sm:$0xff]  }
   0x3   :  { %v964_v3 = vld [vmem:[%s1331_s1 + $0x38] sm:$0xff]   ;;  %887 = vmatprep.subr.bf16.mxu1 %v963_v2  ;;  %v968_v7 = vld [vmem:[%s1331_s1 + $0x30] sm:$0xff]   ;;  %v972_v11 = vld [vmem:[%s1331_s1 + $0x28] sm:$0xff]  }
   0x4   :  { %v965_v4 = vld [vmem:[%s1331_s1 + $0xb8] sm:$0xff]   ;;  %848 = vmatpush3.bf16.msra.mxu0 %v964_v3  ;;  %v969_v8 = vld [vmem:[%s1331_s1 + $0xb0] sm:$0xff]   ;;  %v973_v12 = vld [vmem:[%s1331_s1 + $0xa8] sm:$0xff]  }
   0x5   :  { %888 = vmatpush3.bf16.msra.mxu1 %v965_v4  ;;  %849 = vmatprep.subr.bf16.mxu0 %v966_v5  ;;  %v974_v13 = vld [vmem:[%s1331_s1 + $0x60] sm:$0xff]   ;;  %v978_v17 = vld [vmem:[%s1331_s1 + $0x58] sm:$0xff]   ;;  %v982_v21 = vld [vmem:[%s1331_s1 + $0x50] sm:$0xff]  }
   0x6   :  { %889 = vmatprep.subr.bf16.mxu1 %v967_v6  ;;  %v975_v14 = vld [vmem:[%s1331_s1 + $0xe0] sm:$0xff]   ;;  %v979_v18 = vld [vmem:[%s1331_s1 + $0xd8] sm:$0xff]   ;;  %v983_v22 = vld [vmem:[%s1331_s1 + $0xd0] sm:$0xff]  }
   0x7   :  { %v976_v15 = vld [vmem:[%s1331_s1 + $0x20] sm:$0xff]   ;;  %v980_v19 = vld [vmem:[%s1331_s1 + $0x18] sm:$0xff]   ;;  %v984_v23 = vld [vmem:[%s1331_s1 + $0x10] sm:$0xff]  }
   0x8   :  { %850 = vmatpush3.bf16.msra.mxu0 %v968_v7  ;;  %v977_v16 = vld [vmem:[%s1331_s1 + $0xa0] sm:$0xff]   ;;  %v981_v20 = vld [vmem:[%s1331_s1 + $0x98] sm:$0xff]   ;;  %v985_v24 = vld [vmem:[%s1331_s1 + $0x90] sm:$0xff]  }
   0x9   :  { %890 = vmatpush3.bf16.msra.mxu1 %v969_v8  ;;  %851 = vmatprep.subr.bf16.mxu0 %v970_v9  ;;  %v986_v25 = vld [vmem:[%s1331_s1 + $0x48] sm:$0xff]   ;;  %v990_v29 = vld [vmem:[%s1331_s1 + $0x40] sm:$0xff]   ;;  %v1000_v37 = vld [vmem:[%s1331_s1 + $0x118] sm:$0xff]  }
   0xa   :  { %891 = vmatprep.subr.bf16.mxu1 %v971_v10  ;;  %v987_v26 = vld [vmem:[%s1331_s1 + $0xc8] sm:$0xff]   ;;  %v991_v30 = vld [vmem:[%s1331_s1 + $0xc0] sm:$0xff]   ;;  %v1007_v40 = vld [vmem:[%s1331_s1 + $0x110] sm:$0xff]  }
   0xb   :  { %v988_v27 = vld [vmem:[%s1331_s1 + $0x8] sm:$0xff]   ;;  %v992_v31 = vld [vmem:[%s1331_s1] sm:$0xff]   ;;  %v1010_v44 = vld [vmem:[%s1332_s0 + $0x5c] ss:$20 sps:$4 sm:$0xff]  }
   0xc   :  { %852 = vmatpush3.bf16.msra.mxu0 %v972_v11  ;;  %v989_v28 = vld [vmem:[%s1331_s1 + $0x88] sm:$0xff]   ;;  %v993_v32 = vld [vmem:[%s1331_s1 + $0x80] sm:$0xff]   ;;  %v1015_v49 = vld [vmem:[%s1332_s0 + $0x7c] ss:$20 sps:$4 sm:$0xff]  }
   0xd   :  { %892 = vmatpush3.bf16.msra.mxu1 %v973_v12  ;;  %853 = vmatprep.subr.bf16.mxu0 %v974_v13  ;;  %v994_v33 = vld [vmem:[%s1332_s0] ss:$20 sps:$4 sm:$0xff]   ;;  %v996_v34 = vld [vmem:[%s1332_s0 + $0x4] ss:$20 sps:$4 sm:$0xff]   ;;  %v997_v35 = vld [vmem:[%s1332_s0 + $0x8] ss:$20 sps:$4 sm:$0xff]  }
   0xe   :  { %893 = vmatprep.subr.bf16.mxu1 %v975_v14  ;;  %v999_v36 = vld [vmem:[%s1332_s0 + $0xc] ss:$20 sps:$4 sm:$0xff]   ;;  %475 = vmatprep.mubr.bf16.mxu0 %v996_v34  ;;  %v1003_v39 = vld [vmem:[%s1332_s0 + $0x34] ss:$20 sps:$4 sm:$0xff]   ;;  %v1006_v42 = vld [vmem:[%s1332_s0 + $0x30] ss:$20 sps:$4 sm:$0xff]  }
   0xf   :  { %540 = vmatprep.mubr.bf16.mxu1 %v999_v36  ;;  %v1001_v38 = vld [vmem:[%s1332_s0 + $0x2c] ss:$20 sps:$4 sm:$0xff]   ;;  %v1005_v41 = vld [vmem:[%s1332_s0 + $0x28] ss:$20 sps:$4 sm:$0xff]   ;;  %v1012_v47 = vld [vmem:[%s1332_s0 + $0x50] ss:$20 sps:$4 sm:$0xff]  }
  0x10   :  { %854 = vmatpush3.bf16.msra.mxu0 %v976_v15  ;;  %v1008_v43 = vld [vmem:[%s1332_s0 + $0x54] ss:$20 sps:$4 sm:$0xff]   ;;  %v1021_v46 = vld [vmem:[%s1331_s1 + $0x100] sm:$0xff]   ;;  %v1013_v48 = vld [vmem:[%s1332_s0 + $0x58] ss:$20 sps:$4 sm:$0xff]  }
  0x11   :  { %894 = vmatpush3.bf16.msra.mxu1 %v977_v16  ;;  %855 = vmatprep.subr.bf16.mxu0 %v978_v17  ;;  %v1014_v45 = vld [vmem:[%s1331_s1 + $0x108] sm:$0xff]   ;;  %v1017_v50 = vld [vmem:[%s1332_s0 + $0x84] ss:$20 sps:$4 sm:$0xff]   ;;  %v640_v51 = vld [vmem:[%s1333_s2 + $0x10] sm:$0xff] }
  0x12   :  { %895 = vmatprep.subr.bf16.mxu1 %v979_v18  ;;  %v638_v52 = vld [vmem:[%s1333_s2] sm:$0xff]  ;;  %658 = vperm.xlu1 %961, %v640_v51   ;;  %v641_v53 = vld [vmem:[%s1333_s2 + $0x18] sm:$0xff]  ;;  %v639_v54 = vld [vmem:[%s1333_s2 + $0x8] sm:$0xff] }
  0x13   :  { %648 = vperm.xlu0 %960, %v638_v52   ;;  %v1019_v55 = vld [vmem:[%s1332_s0 + $0x78] ss:$20 sps:$4 sm:$0xff]   ;;  %v1020_v56 = vld [vmem:[%s1332_s0 + $0x80] ss:$20 sps:$4 sm:$0xff]   ;;  %v1022_v57 = vld [vmem:[%s1332_s0 + $0x10] ss:$20 sps:$4 sm:$0xff]  }
  0x14   :  { %856 = vmatpush3.bf16.msra.mxu0 %v980_v19  ;;  %v643_v58 = vld [vmem:[%s1333_s2 + $0x28] sm:$0xff]  ;;  %v1023_v59 = vld [vmem:[%s1332_s0 + $0x60] ss:$20 sps:$4 sm:$0xff]   ;;  %v645_v61 = vld [vmem:[%s1333_s2 + $0x38] sm:$0xff] }
  0x15   :  { %896 = vmatpush3.bf16.msra.mxu1 %v981_v20  ;;  %857 = vmatprep.subr.bf16.mxu0 %v982_v21  ;;  %v642_v60 = vld [vmem:[%s1333_s2 + $0x20] sm:$0xff]  ;;  %v644_v62 = vld [vmem:[%s1333_s2 + $0x30] sm:$0xff]  ;;  %v1024_v63 = vld [vmem:[%s1332_s0 + $0x38] ss:$20 sps:$4 sm:$0xff]  }
  0x16   :  { %897 = vmatprep.subr.bf16.mxu1 %v983_v22  ;;  %663 = vperm.xlu1 %961, %v641_v53   ;;  %v1025_v0 = vld [vmem:[%s1332_s0 + $0x88] ss:$20 sps:$4 sm:$0xff]   ;;  %v694_v2 = vld [vmem:[%s1334_s3] sm:$0xff]  ;;  %v696_v4 = vld [vmem:[%s1334_s3 + $0x10] sm:$0xff] }
  0x17   :  { %653 = vperm.xlu0 %960, %v639_v54   ;;  %v695_v1 = vld [vmem:[%s1334_s3 + $0x8] sm:$0xff]  ;;  %v697_v3 = vld [vmem:[%s1334_s3 + $0x18] sm:$0xff]  ;;  %v698_v6 = vld [vmem:[%s1334_s3 + $0x20] sm:$0xff] }
  0x18   :  { %858 = vmatpush3.bf16.msra.mxu0 %v984_v23  ;;  %v699_v5 = vld [vmem:[%s1334_s3 + $0x28] sm:$0xff]  ;;  %v701_v7 = vld [vmem:[%s1334_s3 + $0x38] sm:$0xff]  ;;  %v700_v8 = vld [vmem:[%s1334_s3 + $0x30] sm:$0xff] }
  0x19   :  { %898 = vmatpush3.bf16.msra.mxu1 %v985_v24  ;;  %859 = vmatprep.subr.bf16.mxu0 %v986_v25 }
  0x1a   :  { %899 = vmatprep.subr.bf16.mxu1 %v987_v26  ;;  %673 = vperm.xlu1 %961, %v643_v58  }
  0x1b   :  { %668 = vperm.xlu0 %960, %v642_v60  }
  0x1c   :  { %860 = vmatpush3.bf16.msra.mxu0 %v988_v27 }
  0x1d   :  { %900 = vmatpush3.bf16.msra.mxu1 %v989_v28  ;;  %861 = vmatprep.subr.bf16.mxu0 %v990_v29 }
  0x1e   :  { %901 = vmatprep.subr.bf16.mxu1 %v991_v30  ;;  %683 = vperm.xlu1 %961, %v645_v61  }
  0x1f   :  { %678 = vperm.xlu0 %960, %v644_v62  }
  0x20   :  { %862 = vmatpush3.bf16.msra.mxu0 %v992_v31 }
  0x21   :  { %902 = vmatpush3.bf16.msra.mxu1 %v993_v32  ;;  %935 = vmatprep.subr.bf16.mxu0 %v1000_v37 }
  0x22   :  { %951 = vmatprep.subr.bf16.mxu1 %v1000_v37  ;;  %709 = vperm.xlu1 %961, %v695_v1  }
  0x23   :  { %476 = vmatmul.mubr.bf16.vlgmr.msra.gmra.mxu0 %v994_v33  ;;  %704 = vperm.xlu0 %960, %v694_v2  }
  0x24   :  { %541 = vmatmul.mubr.bf16.vlgmr.msra.gmra.mxu1 %v997_v35  ;;  %936 = vmatpush3.bf16.msra.mxu0 %v1000_v37 }
  0x25   :  { %955 = vmatpush3.bf16.msra.mxu1 %v1000_v37  ;;  %483 = vmatprep.mubr.bf16.mxu0 %v1001_v38 }
  0x26   :  { %548 = vmatprep.mubr.bf16.mxu1 %v1003_v39  ;;  %937 = vmatprep.subr.bf16.mxu0 %v1007_v40 }
  0x27   :  { %952 = vmatprep.subr.bf16.mxu1 %v1007_v40  ;;  %719 = vperm.xlu1 %961, %v697_v3  }
  0x28   :  { %938 = vmatpush3.bf16.msra.mxu0 %v1007_v40  ;;  %714 = vperm.xlu0 %960, %v696_v4  }
  0x29   :  { %956 = vmatpush3.bf16.msra.mxu1 %v1007_v40  ;;  %939 = vmatprep.subr.bf16.mxu0 %v1014_v45 }
  0x2a   :  { %953 = vmatprep.subr.bf16.mxu1 %v1014_v45 }
  0x2b   :  { %484 = vmatmul.mubr.bf16.gmra.mxu0 %v1005_v41  ;;  %729 = vperm.xlu1 %961, %v699_v5  }
  0x2c   :  { %549 = vmatmul.mubr.bf16.gmra.mxu1 %v1006_v42  ;;  %491 = vmatprep.mubr.bf16.mxu0 %v1008_v43 }
  0x2d   :  { %556 = vmatprep.mubr.bf16.mxu1 %v1010_v44  ;;  %940 = vmatpush3.bf16.msra.mxu0 %v1014_v45 }
  0x2e   :  { %957 = vmatpush3.bf16.msra.mxu1 %v1014_v45  ;;  %941 = vmatprep.subr.bf16.mxu0 %v1021_v46 }
  0x2f   :  { %954 = vmatprep.subr.bf16.mxu1 %v1021_v46  ;;  %724 = vperm.xlu0 %960, %v698_v6  }
  0x30   :  { %739 = vperm.xlu1 %961, %v701_v7  }
  0x31   :  { %942 = vmatpush3.bf16.msra.mxu0 %v1021_v46 }
  0x32   :  { %958 = vmatpush3.bf16.msra.mxu1 %v1021_v46 }
  0x33   :  { %492 = vmatmul.mubr.bf16.gmra.mxu0 %v1012_v47  ;;  %734 = vperm.xlu0 %960, %v700_v8  }
  0x34   :  { %557 = vmatmul.mubr.bf16.gmra.mxu1 %v1013_v48  ;;  %499 = vmatprep.mubr.bf16.mxu0 %v1015_v49 }
  0x35   :  { %564 = vmatprep.mubr.bf16.mxu1 %v1017_v50 }
  0x3b   :  { %500 = vmatmul.mubr.bf16.gmra.mxu0 %v1019_v55 }
  0x3c   :  { %565 = vmatmul.mubr.bf16.gmra.mxu1 %v1020_v56  ;;  %943 = vmatprep.mubr.msk.bf16.mxu0 %vm430_vm0, %v1022_v57 }
  0x3d   :  { %947 = vmatprep.mubr.msk.bf16.mxu1 %vm430_vm0, %v1023_v59 }
  0x43   :  { %944 = vmatmul.mubr.msk.bf16.vlgmr.msra.gmra.mxu0 %vm430_vm0, %v1024_v63 }
  0x44   :  { %948 = vmatmul.mubr.msk.bf16.vlgmr.msra.gmra.mxu1 %vm430_vm0, %v1025_v0 }
  0x8d   :  { %v1274_v10 = vpop.permute.xlu1 %658 }
  0x8e   :  { %v1272_v9 = vpop.permute.xlu0 %648 }
  0x91   :  { %v1278_v17 = vpop.permute.xlu1 %663 }
  0x92   :  { %v1276_v12 = vpop.permute.xlu0 %653 }
  0x95   :  { %v1282_v25 = vpop.permute.xlu1 %673 }
  0x96   :  { %v1280_v20 = vpop.permute.xlu0 %668 }
  0x99   :  { %v1284_v33 = vpop.permute.xlu1 %683 }
  0x9a   :  { %v679_v28 = vpop.permute.xlu0 %678 }
  0x9d   :  { %v1288_v41 = vpop.permute.xlu1 %709 }
  0x9e   :  { %v1286_v36 = vpop.permute.xlu0 %704 }
  0xa2   :  { %v720_v55 = vpop.permute.xlu1 %719 }
  0xa3   :  { %v715_v44 = vpop.permute.xlu0 %714 }
  0xaa   :  { %v725_v60 = vpop.permute.xlu0 %724 }
  0xe3   :  { %v863_v11 = vpop.f32.mrf.mxu0 }
  0xe4   :  { %v903_v13 = vpop.f32.mrf.mxu1 }
  0xe5   :  { %v864_v14 = vpop.f32.mrf.mxu0 }
  0xe6   :  { %v904_v15 = vpop.f32.mrf.mxu1  ;;  %v865_v53 = vadd.f32 %v864_v14, %v863_v11 }
  0xe7   :  { %v866_v16 = vpop.f32.mrf.mxu0  ;;  %v905_v54 = vadd.f32 %v904_v15, %v903_v13 }
  0xe8   :  { %v906_v18 = vpop.f32.mrf.mxu1 }
  0xe9   :  { %v867_v19 = vpop.f32.mrf.mxu0  ;;  %v543_v11 = vadd.f32 %v905_v54, %v865_v53 }
  0xea   :  { %v907_v21 = vpop.f32.mrf.mxu1  ;;  %v868_v5 = vadd.f32 %v867_v19, %v866_v16 }
  0xeb   :  { %v869_v22 = vpop.f32.mrf.mxu0  ;;  %v908_v6 = vadd.f32 %v907_v21, %v906_v18  ;;  %v735_v18 = vpop.permute.xlu0 %734 }
  0xec   :  { %v909_v23 = vpop.f32.mrf.mxu1 }
  0xed   :  { %v870_v24 = vpop.f32.mrf.mxu0 }
  0xee   :  { %v910_v26 = vpop.f32.mrf.mxu1  ;;  %v871_v47 = vadd.f32 %v870_v24, %v869_v22  ;;  %v730_v24 = vpop.permute.xlu1 %729 }
  0xef   :  { %v872_v27 = vpop.f32.mrf.mxu0  ;;  %v911_v48 = vadd.f32 %v910_v26, %v909_v23 }
  0xf0   :  { %v912_v29 = vpop.f32.mrf.mxu1 }
  0xf1   :  { %v873_v30 = vpop.f32.mrf.mxu0  ;;  %v551_v0 = vadd.f32 %v911_v48, %v871_v47 }
  0xf2   :  { %v913_v31 = vpop.f32.mrf.mxu1  ;;  %v874_v61 = vadd.f32 %v873_v30, %v872_v27  ;;  %v740_v48 = vpop.permute.xlu1 %739 }
  0xf3   :  { %v875_v32 = vpop.f32.mrf.mxu0  ;;  %v914_v62 = vadd.f32 %v913_v31, %v912_v29 }
  0xf4   :  { %v915_v34 = vpop.f32.mrf.mxu1 }
  0xf5   :  { %v876_v35 = vpop.f32.mrf.mxu0  ;;  %v554_v30 = vadd.f32 %v914_v62, %v874_v61 }
  0xf6   :  { %v916_v37 = vpop.f32.mrf.mxu1  ;;  %v877_v57 = vadd.f32 %v876_v35, %v875_v32 }
  0xf7   :  { %v878_v38 = vpop.f32.mrf.mxu0  ;;  %v917_v58 = vadd.f32 %v916_v37, %v915_v34 }
  0xf8   :  { %v918_v39 = vpop.f32.mrf.mxu1 }
  0xf9   :  { %v879_v40 = vpop.f32.mrf.mxu0  ;;  %v559_v23 = vadd.f32 %v917_v58, %v877_v57 }
  0xfa   :  { %v919_v42 = vpop.f32.mrf.mxu1  ;;  %v880_v13 = vadd.f32 %v879_v40, %v878_v38  ;;  %v546_v38 = vadd.f32 %v908_v6, %v868_v5 }
  0xfb   :  { %v881_v43 = vpop.f32.mrf.mxu0  ;;  %v920_v14 = vadd.f32 %v919_v42, %v918_v39 }
  0xfc   :  { %v921_v45 = vpop.f32.mrf.mxu1 }
  0xfd   :  { %v882_v46 = vpop.f32.mrf.mxu0 }
  0xfe   :  { %v922_v49 = vpop.f32.mrf.mxu1  ;;  %v883_v50 = vadd.f32 %v882_v46, %v881_v43 }
  0xff   :  { %v923_v51 = vadd.f32 %v922_v49, %v921_v45  ;;  %v884_v52 = vpop.f32.mrf.mxu0 }
 0x100   :  { %v924_v56 = vpop.f32.mrf.mxu1 }
 0x101   :  { %v885_v59 = vpop.f32.mrf.mxu0  ;;  %v567_v4 = vadd.f32 %v923_v51, %v883_v50 }
 0x102   :  { %v925_v63 = vpop.f32.mrf.mxu1  ;;  %v886_v1 = vadd.f32 %v885_v59, %v884_v52 }
 0x103   :  { %v926_v2 = vadd.f32 %v925_v63, %v924_v56  ;;  %v945_v3 = vpop.f32.mrf.mxu0 }
 0x104   :  { %v616_v7 = vadd.f32 %v945_v3, %v551_v0  ;;  %v949_v8 = vpop.f32.mrf.mxu1 }
 0x105   :  { %v632_v15 = vadd.f32 %v949_v8, %v567_v4  ;;  %v607_v22 = vpop.f32.mrf.mxu0  ;;  %v570_v16 = vadd.f32 %v926_v2, %v886_v1 }
 0x106   :  { %v688_v26 = vmul.f32 %v1274_v10, %v616_v7  ;;  %v608_v27 = vadd.f32 %v607_v22, %v543_v11  ;;  %v623_v29 = vpop.f32.mrf.mxu1  ;;  %v562_v10 = vadd.f32 %v920_v14, %v880_v13 }
 0x107   :  { %v692_v31 = vmul.f32 %v679_v28, %v632_v15  ;;  %v624_v32 = vadd.f32 %v623_v29, %v559_v23  ;;  %v946_v34 = vpop.f32.mrf.mxu0 }
 0x108   :  { %v744_v19 = vadd.f32 %v715_v44, %v688_v26  ;;  %v686_v21 = vmul.f32 %v1272_v9, %v608_v27  ;;  %v619_v35 = vadd.f32 %v946_v34, %v554_v30  ;;  %v950_v37 = vpop.f32.mrf.mxu1 }
 0x109   :  { %v748_v39 = vadd.f32 %v735_v18, %v692_v31  ;;  %v690_v40 = vmul.f32 %v1280_v20, %v624_v32  ;;  %v635_v42 = vadd.f32 %v950_v37, %v570_v16  ;;  %v610_v9 = vpop.f32.mrf.mxu0 }
 0x10a   :  { %vm752_vm2 = vcmp.gt.f32.partialorder %v744_v19, 0.0  ;;  %v760_v43 = vmul.f32 0.2, %v744_v19  ;;  %v742_v45 = vadd.f32 %v1286_v36, %v686_v21  ;;  %v689_v28 = vmul.f32 %v1278_v17, %v619_v35  ;;  %v626_v20 = vpop.f32.mrf.mxu1 }
 0x10b   :  { %vm756_vm3 = vcmp.gt.f32.partialorder %v748_v39, 0.0  ;;  %v764_v46 = vmul.f32 0.2, %v748_v39  ;;  %v746_v47 = vadd.f32 %v725_v60, %v690_v40  ;;  %v693_v44 = vmul.f32 %v1284_v33, %v635_v42 }
 0x10c   :  { %v768_v49 = vsel %vm752_vm2, %v744_v19, %v760_v43  ;;  %vm750_vm4 = vcmp.gt.f32.partialorder %v742_v45, 0.0  ;;  %v758_v50 = vmul.f32 0.2, %v742_v45  ;;  %v745_v51 = vadd.f32 %v720_v55, %v689_v28 }
 0x10d   :  { %777 = vst.msk [vmem:[%s1335_s4 + $0x10] sm:$0xff] %vm774_vm1, %v768_v49  ;;  %v772_v36 = vsel %vm756_vm3, %v748_v39, %v764_v46  ;;  %vm754_vm5 = vcmp.gt.f32.partialorder %v746_v47, 0.0  ;;  %v762_v17 = vmul.f32 0.2, %v746_v47  ;;  %v749_v52 = vadd.f32 %v740_v48, %v693_v44 }
 0x10e   :  { %781 = vst.msk [vmem:[%s1335_s4 + $0x30] sm:$0xff] %vm774_vm1, %v772_v36  ;;  %v766_v33 = vsel %vm750_vm4, %v742_v45, %v758_v50  ;;  %vm753_vm6 = vcmp.gt.f32.partialorder %v745_v51, 0.0  ;;  %v761_v53 = vmul.f32 0.2, %v745_v51  ;;  %v611_v54 = vadd.f32 %v610_v9, %v546_v38 }
 0x10f   :  { %775 = vst.msk [vmem:[%s1335_s4] sm:$0xff] %vm774_vm1, %v766_v33  ;;  %v770_v55 = vsel %vm754_vm5, %v746_v47, %v762_v17  ;;  %vm757_vm7 = vcmp.gt.f32.partialorder %v749_v52, 0.0  ;;  %v765_v56 = vmul.f32 0.2, %v749_v52  ;;  %v627_v57 = vadd.f32 %v626_v20, %v562_v10 }
 0x110   :  { %779 = vst.msk [vmem:[%s1335_s4 + $0x20] sm:$0xff] %vm774_vm1, %v770_v55  ;;  %v769_v58 = vsel %vm753_vm6, %v745_v51, %v761_v53  ;;  %v687_v59 = vmul.f32 %v1276_v12, %v611_v54 }
 0x111   :  { %778 = vst.msk [vmem:[%s1335_s4 + $0x18] sm:$0xff] %vm774_vm1, %v769_v58  ;;  %v773_v60 = vsel %vm757_vm7, %v749_v52, %v765_v56  ;;  %v691_v61 = vmul.f32 %v1282_v25, %v627_v57 }
 0x112   :  { %782 = vst.msk [vmem:[%s1335_s4 + $0x38] sm:$0xff] %vm774_vm1, %v773_v60  ;;  %v743_v62 = vadd.f32 %v1288_v41, %v687_v59 }
 0x113   :  { %v747_v63 = vadd.f32 %v730_v24, %v691_v61 }
 0x114   :  { %vm751_vm8 = vcmp.gt.f32.partialorder %v743_v62, 0.0  ;;  %v759_v0 = vmul.f32 0.2, %v743_v62 }
 0x115   :  { %vm755_vm9 = vcmp.gt.f32.partialorder %v747_v63, 0.0  ;;  %v763_v12 = vmul.f32 0.2, %v747_v63 }
 0x116   :  { %v767_v1 = vsel %vm751_vm8, %v743_v62, %v759_v0 }
 0x117   :  { %776 = vst.msk [vmem:[%s1335_s4 + $0x8] sm:$0xff] %vm774_vm1, %v767_v1  ;;  %v771_v2 = vsel %vm755_vm9, %v747_v63, %v763_v12 }
 0x118   :  { %780 = vst.msk [vmem:[%s1335_s4 + $0x28] sm:$0xff] %vm774_vm1, %v771_v2 }

// kernel: fc_discriminator_cod.9
= control target key start
LH: loop header
LB: loop body
LE: loop exit
PB: predicated region body
PF: predicated region fallthrough
CT: control target
= control target key end

     0   :  { %v647_v6 = vmov 0   ;;  %v648_v25 = vmov 1966171168   ;;  %v100_v27 = vlaneseq  ;;  %v649_v43 = vmov 0.0   ;;  %s800_s1 = inlined_call_operand.vmem [shape: bf16[576,8], index: 1, kind: input, shape index: {}]   ;;  %s801_s2 = inlined_call_operand.<no memory space> [shape: f32[1,1], index: 2, kind: input, shape index: {}]   ;;  %s802_s3 = inlined_call_operand.<no memory space> [shape: f32[1,1], index: 3, kind: input, shape index: {}]   ;;  %s803_s0 = inlined_call_operand.vmem [shape: bf16[1,576], index: 0, kind: input, shape index: {}]   ;;  %s804_s4 = inlined_call_operand.vmem [shape: f32[1,8], index: 4, kind: output, shape index: {}]  }
   0x1   :  { %v610_v0 = vld [vmem:[%s800_s1 + $0x78] sm:$0xff]   ;;  %v9_v1 = vstv %s801_s2  ;;  %v11_v3 = vstv %s802_s3  ;;  %609 = vset.pattern.permute.xlu0 %v647_v6  ;;  %v614_v7 = vld [vmem:[%s800_s1 + $0x70] sm:$0xff]   ;;  %v98_v26 = vunpack.c.l.s4 %v648_v25  ;;  %vm650_vm0 = vmmov 0  }
   0x2   :  { %v611_v2 = vld [vmem:[%s800_s1 + $0xf8] sm:$0xff]   ;;  %10 = vst [vmem:[#allocation2] sm:$0x1] %v9_v1  ;;  %544 = vmatprep.subr.bf16.mxu0 %v610_v0  ;;  %12 = vst [vmem:[#allocation3] sm:$0x1] %v11_v3  ;;  %v615_v8 = vld [vmem:[%s800_s1 + $0xf0] sm:$0xff]  }
   0x3   :  { %v612_v4 = vld [vmem:[%s800_s1 + $0x38] sm:$0xff]   ;;  %566 = vmatprep.subr.bf16.mxu1 %v611_v2  ;;  %v616_v9 = vld [vmem:[%s800_s1 + $0x30] sm:$0xff]   ;;  %v618_v11 = vld [vmem:[%s800_s1 + $0x68] sm:$0xff]   ;;  %v99_v32 = vunpack.c.0.s8 %v98_v26  ;;  %v760_v33 = vshrl.u32 %v100_v27, 7  ;;  %vm355_vm1 = vcmask 523264   ;;  %vm501_vm2 = vcmask 57344  }
   0x4   :  { %v613_v5 = vld [vmem:[%s800_s1 + $0xb8] sm:$0xff]   ;;  %545 = vmatpush3.bf16.msra.mxu0 %v612_v4  ;;  %v617_v10 = vld [vmem:[%s800_s1 + $0xb0] sm:$0xff]   ;;  %v619_v12 = vld [vmem:[%s800_s1 + $0xe8] sm:$0xff]  }
   0x5   :  { %567 = vmatpush3.bf16.msra.mxu1 %v613_v5  ;;  %546 = vmatprep.subr.bf16.mxu0 %v614_v7  ;;  %v620_v13 = vld [vmem:[%s800_s1 + $0x28] sm:$0xff]   ;;  %v622_v15 = vld [vmem:[%s800_s1 + $0x60] sm:$0xff]   ;;  %v626_v19 = vld [vmem:[%s800_s1 + $0x58] sm:$0xff]   ;;  %v102_v38 = vsub.s32 %v99_v32, %v760_v33  ;;  %v487_v5 = vsub.s32 0, %v760_v33 }
   0x6   :  { %568 = vmatprep.subr.bf16.mxu1 %v615_v8  ;;  %v621_v14 = vld [vmem:[%s800_s1 + $0xa8] sm:$0xff]   ;;  %v623_v16 = vld [vmem:[%s800_s1 + $0xe0] sm:$0xff]   ;;  %v627_v20 = vld [vmem:[%s800_s1 + $0xd8] sm:$0xff]  }
   0x7   :  { %v624_v17 = vld [vmem:[%s800_s1 + $0x20] sm:$0xff]   ;;  %v628_v21 = vld [vmem:[%s800_s1 + $0x18] sm:$0xff]   ;;  %v630_v23 = vld [vmem:[%s800_s1 + $0x50] sm:$0xff]  }
   0x8   :  { %547 = vmatpush3.bf16.msra.mxu0 %v616_v9  ;;  %v625_v18 = vld [vmem:[%s800_s1 + $0xa0] sm:$0xff]   ;;  %v629_v22 = vld [vmem:[%s800_s1 + $0x98] sm:$0xff]   ;;  %v631_v24 = vld [vmem:[%s800_s1 + $0xd0] sm:$0xff]  }
   0x9   :  { %569 = vmatpush3.bf16.msra.mxu1 %v617_v10  ;;  %548 = vmatprep.subr.bf16.mxu0 %v618_v11  ;;  %v632_v28 = vld [vmem:[%s800_s1 + $0x10] sm:$0xff]   ;;  %v634_v30 = vld [vmem:[%s800_s1 + $0x48] sm:$0xff]   ;;  %v638_v36 = vld [vmem:[%s800_s1 + $0x40] sm:$0xff]  }
   0xa   :  { %570 = vmatprep.subr.bf16.mxu1 %v619_v12  ;;  %v633_v29 = vld [vmem:[%s800_s1 + $0x90] sm:$0xff]   ;;  %v635_v31 = vld [vmem:[%s800_s1 + $0xc8] sm:$0xff]   ;;  %v639_v37 = vld [vmem:[%s800_s1 + $0xc0] sm:$0xff]  }
   0xb   :  { %v636_v34 = vld [vmem:[%s800_s1 + $0x8] sm:$0xff]   ;;  %v640_v39 = vld [vmem:[%s800_s1] sm:$0xff]   ;;  %v643_v48 = vld [vmem:[%s800_s1 + $0x118] sm:$0xff]  }
   0xc   :  { %549 = vmatpush3.bf16.msra.mxu0 %v620_v13  ;;  %v637_v35 = vld [vmem:[%s800_s1 + $0x88] sm:$0xff]   ;;  %v641_v40 = vld [vmem:[%s800_s1 + $0x80] sm:$0xff]   ;;  %v644_v52 = vld [vmem:[%s800_s1 + $0x110] sm:$0xff]  }
   0xd   :  { %571 = vmatpush3.bf16.msra.mxu1 %v621_v14  ;;  %550 = vmatprep.subr.bf16.mxu0 %v622_v15  ;;  %v22_v41 = vld [vmem:[%s803_s0] sm:$0x1f]  ;;  %v645_v54 = vld [vmem:[%s800_s1 + $0x108] sm:$0xff]  }
   0xe   :  { %572 = vmatprep.subr.bf16.mxu1 %v623_v16  ;;  %v103_v42 = vrot.slane %v22_v41, %v102_v38  ;;  %v479_v46 = vld [vmem:[#allocation2] sm:$0x1]  ;;  %v490_v51 = vld [vmem:[#allocation3] sm:$0x1]  ;;  %v96_v53 = vcombine.high %v22_v41, %v22_v41 }
   0xf   :  { %482 = vperm.xlu0 %609, %v479_v46   ;;  %v646_v56 = vld [vmem:[%s800_s1 + $0x100] sm:$0xff]  }
  0x10   :  { %551 = vmatpush3.bf16.msra.mxu0 %v624_v17  ;;  %v111_v44 = vcombine.high %v103_v42, %v103_v42  ;;  %v118_v45 = vrot.slane %v103_v42, %v102_v38  ;;  %v110_v55 = vrot.slane %v96_v53, %v102_v38 }
  0x11   :  { %573 = vmatpush3.bf16.msra.mxu1 %v625_v18  ;;  %552 = vmatprep.subr.bf16.mxu0 %v626_v19 }
  0x12   :  { %574 = vmatprep.subr.bf16.mxu1 %v627_v20  ;;  %v132_v47 = vrot.slane %v111_v44, %v102_v38  ;;  %v133_v49 = vcombine.high %v118_v45, %v118_v45  ;;  %v125_v57 = vrot.slane %v110_v55, %v102_v38 }
  0x13   :  { %493 = vperm.xlu0 %609, %v490_v51  }
  0x14   :  { %553 = vmatpush3.bf16.msra.mxu0 %v628_v21  ;;  %391 = vmatprep.mubr.bf16.mxu0 %v132_v47  ;;  %v134_v50 = vcombine.high %v132_v47, %v132_v47 }
  0x15   :  { %575 = vmatpush3.bf16.msra.mxu1 %v629_v22  ;;  %554 = vmatprep.subr.bf16.mxu0 %v630_v23 }
  0x16   :  { %576 = vmatprep.subr.bf16.mxu1 %v631_v24  ;;  %431 = vmatprep.mubr.bf16.mxu1 %v134_v50 }
  0x18   :  { %555 = vmatpush3.bf16.msra.mxu0 %v632_v28 }
  0x19   :  { %577 = vmatpush3.bf16.msra.mxu1 %v633_v29  ;;  %556 = vmatprep.subr.bf16.mxu0 %v634_v30 }
  0x1a   :  { %578 = vmatprep.subr.bf16.mxu1 %v635_v31 }
  0x1c   :  { %557 = vmatpush3.bf16.msra.mxu0 %v636_v34 }
  0x1d   :  { %579 = vmatpush3.bf16.msra.mxu1 %v637_v35  ;;  %558 = vmatprep.subr.bf16.mxu0 %v638_v36 }
  0x1e   :  { %580 = vmatprep.subr.bf16.mxu1 %v639_v37 }
  0x20   :  { %559 = vmatpush3.bf16.msra.mxu0 %v640_v39 }
  0x21   :  { %581 = vmatpush3.bf16.msra.mxu1 %v641_v40  ;;  %593 = vmatprep.subr.bf16.mxu0 %v649_v43 }
  0x23   :  { %392 = vmatmul.mubr.bf16.vlgmr.msra.gmra.mxu0 %v118_v45 }
  0x24   :  { %594 = vmatpush3.bf16.msra.mxu0 %v643_v48  ;;  %432 = vmatmul.mubr.bf16.vlgmr.msra.gmra.mxu1 %v133_v49 }
  0x25   :  { %595 = vmatprep.subr.bf16.mxu0 %v649_v43  ;;  %601 = vmatprep.mubr.msk.bf16.mxu0 %vm650_vm0, %v649_v43 }
  0x28   :  { %596 = vmatpush3.bf16.msra.mxu0 %v644_v52 }
  0x29   :  { %597 = vmatprep.subr.bf16.mxu0 %v649_v43 }
  0x2c   :  { %598 = vmatpush3.bf16.msra.mxu0 %v645_v54 }
  0x2d   :  { %599 = vmatprep.subr.bf16.mxu0 %v649_v43 }
  0x30   :  { %600 = vmatpush3.bf16.msra.mxu0 %v646_v56 }
  0x33   :  { %602 = vmatmul.mubr.msk.bf16.vlgmr.msra.gmra.mxu0 %vm355_vm1, %v125_v57 }
  0x8a   :  { %v483_v2 = vpop.permute.xlu0 %482 }
  0x8b   :  { %v488_v9 = vrot.slane %v483_v2, %v487_v5 }
  0x8e   :  { %v494_v7 = vpop.permute.xlu0 %493 }
  0x8f   :  { %v499_v12 = vrot.slane %v494_v7, %v487_v5 }
  0xe3   :  { %v560_v58 = vpop.f32.mrf.mxu0 }
  0xe4   :  { %v582_v59 = vpop.f32.mrf.mxu1 }
  0xe5   :  { %v561_v60 = vpop.f32.mrf.mxu0 }
  0xe6   :  { %v583_v61 = vpop.f32.mrf.mxu1  ;;  %v562_v3 = vadd.f32 %v561_v60, %v560_v58 }
  0xe7   :  { %v563_v62 = vpop.f32.mrf.mxu0  ;;  %v584_v4 = vadd.f32 %v583_v61, %v582_v59 }
  0xe8   :  { %v585_v0 = vpop.f32.mrf.mxu1 }
  0xe9   :  { %v564_v63 = vpop.f32.mrf.mxu0  ;;  %v434_v6 = vadd.f32 %v584_v4, %v562_v3 }
  0xea   :  { %v586_v1 = vpop.f32.mrf.mxu1 }
  0xf3   :  { %v473_v8 = vpop.f32.mrf.mxu0 }
  0xf4   :  { %v474_v10 = vadd.f32 %v473_v8, %v434_v6 }
  0xf5   :  { %v603_v11 = vpop.f32.mrf.mxu0 }
  0xf6   :  { %v489_v13 = vmul.f32 %v488_v9, %v474_v10 }
  0xf7   :  { %v476_v14 = vpop.f32.mrf.mxu0 }
  0xf8   :  { %v500_v15 = vadd.f32 %v499_v12, %v489_v13 }
  0xf9   :  { %v604_v16 = vpop.f32.mrf.mxu0 }
  0xfa   :  { %502 = vst.msk [vmem:[%s804_s4] sm:$0x1] %vm501_vm2, %v500_v15 }

</bundles_post_ra>
